<compile_context>
chip_gen: v7x
topology: tpu7x:2x2x1
jax: 0.10.0
libtpu: 0.0.40
codegen_flags: <defaults>
</compile_context>

<pallas_src>
import jax
import jax.numpy as jnp
from jax import lax
from jax.experimental import pallas as pl
from jax.experimental.pallas import tpu as pltpu


# (p, a) pairs that contribute to slab-row offset r = p + a  (and identically
# (q, b) pairs for column offset), from the polyphase decomposition.
_PA_FOR_OFFSET = {0: ((0, 0),), 1: ((0, 1), (1, 0)), 2: ((1, 1),)}


def _poly_conv_kernel(x_ref, halo_ref, w_ref, b_ref, o_ref, slab_ref):
    """Fused nearest-2x upsample + 3x3 'same' conv (polyphase form).

    x_ref:    (1, TH, W+2, Cin)   row tile of the width-padded input
    halo_ref: (1, 2,  W+2, Cin)   [row above tile, row below tile] (zero at edges)
    w_ref:    (16, Cin, Cout)     phase weights, tap = ((p*2+q)*2+a)*2+b
    b_ref:    (1, Cout)
    o_ref:    (4, TH, W, Cout)    phase-major output, phase = p*2+q
    slab_ref: (TH+2, W+2, Cin)    VMEM scratch: halo'd input slab
    """
    th = x_ref.shape[1]
    w = x_ref.shape[2] - 2
    c_in = x_ref.shape[3]
    c_out = o_ref.shape[3]

    # Assemble the halo'd slab once in VMEM scratch (one small tile copy
    # instead of a 4x upsampled+padded image round-trip through HBM).
    slab_ref[0] = halo_ref[0, 0]
    slab_ref[pl.ds(1, th)] = x_ref[0]
    slab_ref[th + 1] = halo_ref[0, 1]

    bias = b_ref[0]                                          # (Cout,)

    # Four per-phase accumulators in f32 (tile size is chosen so these stay
    # small; for large dims shrink TH via the VMEM budget in the wrapper).
    acc = {(p, q): jnp.zeros((th * w, c_out), jnp.float32)
           for p in range(2) for q in range(2)}

    # 9 distinct shifted patches; each feeds 1..4 of the 16 taps.
    for r in range(3):            # row offset into the slab
        for s in range(3):        # column offset into the slab
            patch = slab_ref[pl.ds(r, th), pl.ds(s, w), :]   # (TH, W, Cin)
            # With W % 8 == 0 this collapse is layout-preserving (no copy).
            patch2d = patch.reshape(th * w, c_in)
            for (p, a) in _PA_FOR_OFFSET[r]:
                for (q, b2) in _PA_FOR_OFFSET[s]:
                    tap = ((p * 2 + q) * 2 + a) * 2 + b2
                    acc[(p, q)] = acc[(p, q)] + jnp.dot(
                        patch2d, w_ref[tap],
                        preferred_element_type=jnp.float32)

    for p in range(2):
        for q in range(2):
            o_ref[p * 2 + q] = (acc[(p, q)] + bias).reshape(
                th, w, c_out).astype(o_ref.dtype)


def _pick_row_tile(h, w, c_in, c_out, budget_bytes=6 << 20):
    """Largest divisor of h whose per-step (double-buffered) working set fits."""
    best = 1
    for th in range(1, h + 1):
        if h % th:
            continue
        need = 4 * (2 * th * (w + 2) * c_in          # input tile (x2 buffers)
                    + 2 * 2 * (w + 2) * c_in         # halo rows  (x2 buffers)
                    + 2 * 4 * th * w * c_out         # output     (x2 buffers)
                    + (th + 2) * (w + 2) * c_in      # slab scratch
                    + 16 * c_in * c_out + c_out)     # weights + bias
        if need <= budget_bytes:
            best = th
    return best


def upsample_module_forward(x_nchw, weight, bias, row_tile=None):
    """Upsample(dim) forward: nearest-2x upsample then 3x3 conv (padding=1).

    x_nchw: (N, C, H, W) f32, weight: (Cout, Cin, 3, 3), bias: (Cout,)
    returns (N, Cout, 2H, 2W) f32.
    """
    n, c_in, h, w = x_nchw.shape
    c_out = weight.shape[0]

    if row_tile is None:
        row_tile = _pick_row_tile(h, w, c_in, c_out)
    row_tile = max(1, min(int(row_tile), h))
    while h % row_tile:
        row_tile -= 1
    th = row_tile
    t_tiles = h // th

    # ---- glue at ORIGINAL resolution only (cheap) ----
    x_nhwc = jnp.transpose(x_nchw, (0, 2, 3, 1))                 # (N, H, W, C)
    x_pad = jnp.pad(x_nhwc, ((0, 0), (1, 1), (1, 1), (0, 0)))    # (N, H+2, W+2, C)
    x_main = x_pad[:, 1:h + 1]                                   # (N, H, W+2, C)
    top = x_pad[:, 0:h:th]                                       # (N, T, W+2, C)
    bot = x_pad[:, th + 1:h + 2:th]                              # (N, T, W+2, C)
    halos = jnp.stack([top, bot], axis=2).reshape(n, 2 * t_tiles, w + 2, c_in)

    # Polyphase weights: conv3x3(up2(x)) == 4 phase-specific 2x2 convs on x.
    w_t = jnp.transpose(weight, (2, 3, 1, 0))                    # (3, 3, Cin, Cout)
    sel = jnp.array([[[1., 0., 0.], [0., 1., 1.]],
                     [[1., 1., 0.], [0., 0., 1.]]],
                    dtype=weight.dtype)                          # [phase, a, k]
    w16 = jnp.einsum("pak,qbl,klio->pqabio", sel, sel, w_t).reshape(16, c_in, c_out)
    b2d = bias.reshape(1, c_out)

    flops = 2 * 16 * n * h * w * c_in * c_out
    bytes_accessed = 4 * (x_main.size + halos.size + w16.size + b2d.size
                          + n * 4 * h * w * c_out)
    cost = pl.CostEstimate(flops=int(flops), transcendentals=0,
                           bytes_accessed=int(bytes_accessed))

    out_phases = pl.pallas_call(
        _poly_conv_kernel,
        out_shape=jax.ShapeDtypeStruct((n * 4, h, w, c_out), x_nchw.dtype),
        grid_spec=pltpu.PrefetchScalarGridSpec(
            num_scalar_prefetch=0,
            grid=(n, t_tiles),
            in_specs=[
                pl.BlockSpec((1, th, w + 2, c_in), lambda b, t: (b, t, 0, 0)),
                pl.BlockSpec((1, 2, w + 2, c_in), lambda b, t: (b, t, 0, 0)),
                pl.BlockSpec((16, c_in, c_out), lambda b, t: (0, 0, 0)),
                pl.BlockSpec((1, c_out), lambda b, t: (0, 0)),
            ],
            out_specs=pl.BlockSpec((4, th, w, c_out), lambda b, t: (b, t, 0, 0)),
            scratch_shapes=[pltpu.VMEM((th + 2, w + 2, c_in), x_nchw.dtype)],
        ),
        compiler_params=pltpu.CompilerParams(
            dimension_semantics=("parallel", "parallel"),
            vmem_limit_bytes=32 * 1024 * 1024),
        cost_estimate=cost,
    )(x_main, halos, w16, b2d)

    # De-interleave phases + NHWC->NCHW in ONE fused transpose.
    out = out_phases.reshape(n, 2, 2, h, w, c_out)               # (n, p, q, i, j, c)
    out = out.transpose(0, 5, 3, 1, 4, 2).reshape(n, c_out, 2 * h, 2 * w)
    return out


def _reference(x_nchw, weight, bias):
    """Pure-JAX reference (nearest 2x upsample + conv2d, NCHW)."""
    x_up = jnp.repeat(jnp.repeat(x_nchw, 2, axis=2), 2, axis=3)
    y = lax.conv_general_dilated(
        x_up, weight, window_strides=(1, 1), padding=((1, 1), (1, 1)),
        dimension_numbers=("NCHW", "OIHW", "NCHW"))
    return y + bias.reshape(1, -1, 1, 1)


if __name__ == "__main__":
    key = jax.random.PRNGKey(0)
    k_x, k_w, k_b = jax.random.split(key, 3)

    N, C, H, W = 2, 4, 16, 16
    x = jax.random.normal(k_x, (N, C, H, W), dtype=jnp.float32)

    # Deterministic parameter init (PyTorch Conv2d-style uniform bound).
    fan_in = C * 3 * 3
    bound = 1.0 / (fan_in ** 0.5)
    weight = jax.random.uniform(k_w, (C, C, 3, 3), jnp.float32, -bound, bound)
    bias = jax.random.uniform(k_b, (C,), jnp.float32, -bound, bound)

    fwd = jax.jit(upsample_module_forward, static_argnames=("row_tile",))
    ref = _reference(x, weight, bias)

    # Multi-row-tile path (exercises the halo rows across tiles).
    out_tiled = jax.block_until_ready(fwd(x, weight, bias, row_tile=8))
    assert out_tiled.shape == (N, C, 2 * H, 2 * W)
    assert jnp.allclose(out_tiled, ref, atol=1e-4, rtol=1e-4)

    # Auto-picked (single-tile for this small shape) path.
    out_auto = jax.block_until_ready(fwd(x, weight, bias))
    assert jnp.allclose(out_auto, ref, atol=1e-4, rtol=1e-4)

    print("KERNEL_OK")
</pallas_src>

<mosaic_0001>
module attributes {stable_mosaic.version = 11 : i64} {
  func.func @_poly_conv_kernel(%arg0: i32, %arg1: i32, %arg2: memref<1x8x18x4xf32, #tpu.memory_space<vmem>>, %arg3: memref<1x2x18x4xf32, #tpu.memory_space<vmem>>, %arg4: memref<16x4x4xf32, #tpu.memory_space<vmem>>, %arg5: memref<1x4xf32, #tpu.memory_space<vmem>>, %arg6: memref<4x8x16x4xf32, #tpu.memory_space<vmem>>, %arg7: memref<10x18x4xf32, #tpu.memory_space<vmem>>) attributes {dimension_semantics = [#tpu.dimension_semantics<parallel>, #tpu.dimension_semantics<parallel>], iteration_bounds = array<i64: 2, 2>, scalar_prefetch = 0 : i64, scratch_operands = 1 : i64, tpu.core_type = #tpu.core_type<tc>, window_params = [{transform_indices = @transform_0, window_bounds = array<i64: 1, 8, 18, 4>}, {transform_indices = @transform_1, window_bounds = array<i64: 1, 2, 18, 4>}, {pipeline_mode = #tpu.pipeline_mode<synchronous>, transform_indices = @transform_2, window_bounds = array<i64: 16, 4, 4>}, {pipeline_mode = #tpu.pipeline_mode<synchronous>, transform_indices = @transform_3, window_bounds = array<i64: 1, 4>}, {transform_indices = @transform_4, window_bounds = array<i64: 4, 8, 16, 4>}]} {
    %c0 = arith.constant 0 : index
    %c0_0 = arith.constant 0 : index
    %c0_1 = arith.constant 0 : index
    %c0_2 = arith.constant 0 : index
    %0 = vector.load %arg3[%c0, %c0_0, %c0_1, %c0_2] : memref<1x2x18x4xf32, #tpu.memory_space<vmem>>, vector<1x1x18x4xf32>
    %1 = vector.shape_cast %0 : vector<1x1x18x4xf32> to vector<18x4xf32>
    %c0_3 = arith.constant 0 : index
    %c0_4 = arith.constant 0 : index
    %c0_5 = arith.constant 0 : index
    %2 = vector.load %arg7[%c0_3, %c0_4, %c0_5] : memref<10x18x4xf32, #tpu.memory_space<vmem>>, vector<1x18x4xf32>
    %3 = vector.shape_cast %2 : vector<1x18x4xf32> to vector<18x4xf32>
    %4 = vector.shape_cast %1 : vector<18x4xf32> to vector<1x18x4xf32>
    tpu.vector_store %arg7[%c0_3, %c0_4, %c0_5], %4 {strides = array<i32>} : memref<10x18x4xf32, #tpu.memory_space<vmem>>, vector<1x18x4xf32>,
    %c0_6 = arith.constant 0 : index
    %c0_7 = arith.constant 0 : index
    %c0_8 = arith.constant 0 : index
    %c0_9 = arith.constant 0 : index
    %5 = vector.load %arg2[%c0_6, %c0_7, %c0_8, %c0_9] : memref<1x8x18x4xf32, #tpu.memory_space<vmem>>, vector<1x8x18x4xf32>
    %6 = vector.shape_cast %5 : vector<1x8x18x4xf32> to vector<8x18x4xf32>
    %c1 = arith.constant 1 : index
    %c0_10 = arith.constant 0 : index
    %c0_11 = arith.constant 0 : index
    %7 = vector.load %arg7[%c1, %c0_10, %c0_11] : memref<10x18x4xf32, #tpu.memory_space<vmem>>, vector<8x18x4xf32>
    tpu.vector_store %arg7[%c1, %c0_10, %c0_11], %6 {strides = array<i32>} : memref<10x18x4xf32, #tpu.memory_space<vmem>>, vector<8x18x4xf32>,
    %c0_12 = arith.constant 0 : index
    %c1_13 = arith.constant 1 : index
    %c0_14 = arith.constant 0 : index
    %c0_15 = arith.constant 0 : index
    %8 = vector.load %arg3[%c0_12, %c1_13, %c0_14, %c0_15] : memref<1x2x18x4xf32, #tpu.memory_space<vmem>>, vector<1x1x18x4xf32>
    %9 = vector.shape_cast %8 : vector<1x1x18x4xf32> to vector<18x4xf32>
    %c9 = arith.constant 9 : index
    %c0_16 = arith.constant 0 : index
    %c0_17 = arith.constant 0 : index
    %10 = vector.load %arg7[%c9, %c0_16, %c0_17] : memref<10x18x4xf32, #tpu.memory_space<vmem>>, vector<1x18x4xf32>
    %11 = vector.shape_cast %10 : vector<1x18x4xf32> to vector<18x4xf32>
    %12 = vector.shape_cast %9 : vector<18x4xf32> to vector<1x18x4xf32>
    tpu.vector_store %arg7[%c9, %c0_16, %c0_17], %12 {strides = array<i32>} : memref<10x18x4xf32, #tpu.memory_space<vmem>>, vector<1x18x4xf32>,
    %c0_18 = arith.constant 0 : index
    %c0_19 = arith.constant 0 : index
    %13 = vector.load %arg5[%c0_18, %c0_19] : memref<1x4xf32, #tpu.memory_space<vmem>>, vector<1x4xf32>
    %14 = vector.shape_cast %13 : vector<1x4xf32> to vector<4xf32>
    %cst = arith.constant 0.000000e+00 : f32
    %15 = vector.broadcast %cst : f32 to vector<128x4xf32>
    %cst_20 = arith.constant 0.000000e+00 : f32
    %16 = vector.broadcast %cst_20 : f32 to vector<128x4xf32>
    %cst_21 = arith.constant 0.000000e+00 : f32
    %17 = vector.broadcast %cst_21 : f32 to vector<128x4xf32>
    %cst_22 = arith.constant 0.000000e+00 : f32
    %18 = vector.broadcast %cst_22 : f32 to vector<128x4xf32>
    %c0_23 = arith.constant 0 : index
    %c0_24 = arith.constant 0 : index
    %c0_25 = arith.constant 0 : index
    %19 = vector.load %arg7[%c0_23, %c0_24, %c0_25] : memref<10x18x4xf32, #tpu.memory_space<vmem>>, vector<8x16x4xf32>
    %20 = vector.shape_cast %19 : vector<8x16x4xf32> to vector<128x4xf32>
    %c0_26 = arith.constant 0 : index
    %c0_27 = arith.constant 0 : index
    %c0_28 = arith.constant 0 : index
    %21 = vector.load %arg4[%c0_26, %c0_27, %c0_28] : memref<16x4x4xf32, #tpu.memory_space<vmem>>, vector<1x4x4xf32>
    %22 = vector.shape_cast %21 : vector<1x4x4xf32> to vector<4x4xf32>
    %cst_29 = arith.constant dense<0.000000e+00> : vector<128x4xf32>
    %23 = tpu.matmul %20, %22, %cst_29 {dimension_numbers = #tpu.dot_dimension_numbers<[1], [0], [0], [1], [0, 0, 1, 1], [], []>} : vector<128x4xf32>, vector<4x4xf32>, vector<128x4xf32> -> vector<128x4xf32>
    %24 = arith.addf %15, %23 : vector<128x4xf32>
    %c0_30 = arith.constant 0 : index
    %c1_31 = arith.constant 1 : index
    %c0_32 = arith.constant 0 : index
    %25 = vector.load %arg7[%c0_30, %c1_31, %c0_32] : memref<10x18x4xf32, #tpu.memory_space<vmem>>, vector<8x16x4xf32>
    %26 = vector.shape_cast %25 : vector<8x16x4xf32> to vector<128x4xf32>
    %c1_33 = arith.constant 1 : index
    %c0_34 = arith.constant 0 : index
    %c0_35 = arith.constant 0 : index
    %27 = vector.load %arg4[%c1_33, %c0_34, %c0_35] : memref<16x4x4xf32, #tpu.memory_space<vmem>>, vector<1x4x4xf32>
    %28 = vector.shape_cast %27 : vector<1x4x4xf32> to vector<4x4xf32>
    %cst_36 = arith.constant dense<0.000000e+00> : vector<128x4xf32>
    %29 = tpu.matmul %26, %28, %cst_36 {dimension_numbers = #tpu.dot_dimension_numbers<[1], [0], [0], [1], [0, 0, 1, 1], [], []>} : vector<128x4xf32>, vector<4x4xf32>, vector<128x4xf32> -> vector<128x4xf32>
    %30 = arith.addf %24, %29 : vector<128x4xf32>
    %c4 = arith.constant 4 : index
    %c0_37 = arith.constant 0 : index
    %c0_38 = arith.constant 0 : index
    %31 = vector.load %arg4[%c4, %c0_37, %c0_38] : memref<16x4x4xf32, #tpu.memory_space<vmem>>, vector<1x4x4xf32>
    %32 = vector.shape_cast %31 : vector<1x4x4xf32> to vector<4x4xf32>
    %cst_39 = arith.constant dense<0.000000e+00> : vector<128x4xf32>
    %33 = tpu.matmul %26, %32, %cst_39 {dimension_numbers = #tpu.dot_dimension_numbers<[1], [0], [0], [1], [0, 0, 1, 1], [], []>} : vector<128x4xf32>, vector<4x4xf32>, vector<128x4xf32> -> vector<128x4xf32>
    %34 = arith.addf %16, %33 : vector<128x4xf32>
    %c0_40 = arith.constant 0 : index
    %c2 = arith.constant 2 : index
    %c0_41 = arith.constant 0 : index
    %35 = vector.load %arg7[%c0_40, %c2, %c0_41] : memref<10x18x4xf32, #tpu.memory_space<vmem>>, vector<8x16x4xf32>
    %36 = vector.shape_cast %35 : vector<8x16x4xf32> to vector<128x4xf32>
    %c5 = arith.constant 5 : index
    %c0_42 = arith.constant 0 : index
    %c0_43 = arith.constant 0 : index
    %37 = vector.load %arg4[%c5, %c0_42, %c0_43] : memref<16x4x4xf32, #tpu.memory_space<vmem>>, vector<1x4x4xf32>
    %38 = vector.shape_cast %37 : vector<1x4x4xf32> to vector<4x4xf32>
    %cst_44 = arith.constant dense<0.000000e+00> : vector<128x4xf32>
    %39 = tpu.matmul %36, %38, %cst_44 {dimension_numbers = #tpu.dot_dimension_numbers<[1], [0], [0], [1], [0, 0, 1, 1], [], []>} : vector<128x4xf32>, vector<4x4xf32>, vector<128x4xf32> -> vector<128x4xf32>
    %40 = arith.addf %34, %39 : vector<128x4xf32>
    %c1_45 = arith.constant 1 : index
    %c0_46 = arith.constant 0 : index
    %c0_47 = arith.constant 0 : index
    %41 = vector.load %arg7[%c1_45, %c0_46, %c0_47] : memref<10x18x4xf32, #tpu.memory_space<vmem>>, vector<8x16x4xf32>
    %42 = vector.shape_cast %41 : vector<8x16x4xf32> to vector<128x4xf32>
    %c2_48 = arith.constant 2 : index
    %c0_49 = arith.constant 0 : index
    %c0_50 = arith.constant 0 : index
    %43 = vector.load %arg4[%c2_48, %c0_49, %c0_50] : memref<16x4x4xf32, #tpu.memory_space<vmem>>, vector<1x4x4xf32>
    %44 = vector.shape_cast %43 : vector<1x4x4xf32> to vector<4x4xf32>
    %cst_51 = arith.constant dense<0.000000e+00> : vector<128x4xf32>
    %45 = tpu.matmul %42, %44, %cst_51 {dimension_numbers = #tpu.dot_dimension_numbers<[1], [0], [0], [1], [0, 0, 1, 1], [], []>} : vector<128x4xf32>, vector<4x4xf32>, vector<128x4xf32> -> vector<128x4xf32>
    %46 = arith.addf %30, %45 : vector<128x4xf32>
    %c8 = arith.constant 8 : index
    %c0_52 = arith.constant 0 : index
    %c0_53 = arith.constant 0 : index
    %47 = vector.load %arg4[%c8, %c0_52, %c0_53] : memref<16x4x4xf32, #tpu.memory_space<vmem>>, vector<1x4x4xf32>
    %48 = vector.shape_cast %47 : vector<1x4x4xf32> to vector<4x4xf32>
    %cst_54 = arith.constant dense<0.000000e+00> : vector<128x4xf32>
    %49 = tpu.matmul %42, %48, %cst_54 {dimension_numbers = #tpu.dot_dimension_numbers<[1], [0], [0], [1], [0, 0, 1, 1], [], []>} : vector<128x4xf32>, vector<4x4xf32>, vector<128x4xf32> -> vector<128x4xf32>
    %50 = arith.addf %17, %49 : vector<128x4xf32>
    %c1_55 = arith.constant 1 : index
    %c1_56 = arith.constant 1 : index
    %c0_57 = arith.constant 0 : index
    %51 = vector.load %arg7[%c1_55, %c1_56, %c0_57] : memref<10x18x4xf32, #tpu.memory_space<vmem>>, vector<8x16x4xf32>
    %52 = vector.shape_cast %51 : vector<8x16x4xf32> to vector<128x4xf32>
    %c3 = arith.constant 3 : index
    %c0_58 = arith.constant 0 : index
    %c0_59 = arith.constant 0 : index
    %53 = vector.load %arg4[%c3, %c0_58, %c0_59] : memref<16x4x4xf32, #tpu.memory_space<vmem>>, vector<1x4x4xf32>
    %54 = vector.shape_cast %53 : vector<1x4x4xf32> to vector<4x4xf32>
    %cst_60 = arith.constant dense<0.000000e+00> : vector<128x4xf32>
    %55 = tpu.matmul %52, %54, %cst_60 {dimension_numbers = #tpu.dot_dimension_numbers<[1], [0], [0], [1], [0, 0, 1, 1], [], []>} : vector<128x4xf32>, vector<4x4xf32>, vector<128x4xf32> -> vector<128x4xf32>
    %56 = arith.addf %46, %55 : vector<128x4xf32>
    %c6 = arith.constant 6 : index
    %c0_61 = arith.constant 0 : index
    %c0_62 = arith.constant 0 : index
    %57 = vector.load %arg4[%c6, %c0_61, %c0_62] : memref<16x4x4xf32, #tpu.memory_space<vmem>>, vector<1x4x4xf32>
    %58 = vector.shape_cast %57 : vector<1x4x4xf32> to vector<4x4xf32>
    %cst_63 = arith.constant dense<0.000000e+00> : vector<128x4xf32>
    %59 = tpu.matmul %52, %58, %cst_63 {dimension_numbers = #tpu.dot_dimension_numbers<[1], [0], [0], [1], [0, 0, 1, 1], [], []>} : vector<128x4xf32>, vector<4x4xf32>, vector<128x4xf32> -> vector<128x4xf32>
    %60 = arith.addf %40, %59 : vector<128x4xf32>
    %c9_64 = arith.constant 9 : index
    %c0_65 = arith.constant 0 : index
    %c0_66 = arith.constant 0 : index
    %61 = vector.load %arg4[%c9_64, %c0_65, %c0_66] : memref<16x4x4xf32, #tpu.memory_space<vmem>>, vector<1x4x4xf32>
    %62 = vector.shape_cast %61 : vector<1x4x4xf32> to vector<4x4xf32>
    %cst_67 = arith.constant dense<0.000000e+00> : vector<128x4xf32>
    %63 = tpu.matmul %52, %62, %cst_67 {dimension_numbers = #tpu.dot_dimension_numbers<[1], [0], [0], [1], [0, 0, 1, 1], [], []>} : vector<128x4xf32>, vector<4x4xf32>, vector<128x4xf32> -> vector<128x4xf32>
    %64 = arith.addf %50, %63 : vector<128x4xf32>
    %c12 = arith.constant 12 : index
    %c0_68 = arith.constant 0 : index
    %c0_69 = arith.constant 0 : index
    %65 = vector.load %arg4[%c12, %c0_68, %c0_69] : memref<16x4x4xf32, #tpu.memory_space<vmem>>, vector<1x4x4xf32>
    %66 = vector.shape_cast %65 : vector<1x4x4xf32> to vector<4x4xf32>
    %cst_70 = arith.constant dense<0.000000e+00> : vector<128x4xf32>
    %67 = tpu.matmul %52, %66, %cst_70 {dimension_numbers = #tpu.dot_dimension_numbers<[1], [0], [0], [1], [0, 0, 1, 1], [], []>} : vector<128x4xf32>, vector<4x4xf32>, vector<128x4xf32> -> vector<128x4xf32>
    %68 = arith.addf %18, %67 : vector<128x4xf32>
    %c1_71 = arith.constant 1 : index
    %c2_72 = arith.constant 2 : index
    %c0_73 = arith.constant 0 : index
    %69 = vector.load %arg7[%c1_71, %c2_72, %c0_73] : memref<10x18x4xf32, #tpu.memory_space<vmem>>, vector<8x16x4xf32>
    %70 = vector.shape_cast %69 : vector<8x16x4xf32> to vector<128x4xf32>
    %c7 = arith.constant 7 : index
    %c0_74 = arith.constant 0 : index
    %c0_75 = arith.constant 0 : index
    %71 = vector.load %arg4[%c7, %c0_74, %c0_75] : memref<16x4x4xf32, #tpu.memory_space<vmem>>, vector<1x4x4xf32>
    %72 = vector.shape_cast %71 : vector<1x4x4xf32> to vector<4x4xf32>
    %cst_76 = arith.constant dense<0.000000e+00> : vector<128x4xf32>
    %73 = tpu.matmul %70, %72, %cst_76 {dimension_numbers = #tpu.dot_dimension_numbers<[1], [0], [0], [1], [0, 0, 1, 1], [], []>} : vector<128x4xf32>, vector<4x4xf32>, vector<128x4xf32> -> vector<128x4xf32>
    %74 = arith.addf %60, %73 : vector<128x4xf32>
    %c13 = arith.constant 13 : index
    %c0_77 = arith.constant 0 : index
    %c0_78 = arith.constant 0 : index
    %75 = vector.load %arg4[%c13, %c0_77, %c0_78] : memref<16x4x4xf32, #tpu.memory_space<vmem>>, vector<1x4x4xf32>
    %76 = vector.shape_cast %75 : vector<1x4x4xf32> to vector<4x4xf32>
    %cst_79 = arith.constant dense<0.000000e+00> : vector<128x4xf32>
    %77 = tpu.matmul %70, %76, %cst_79 {dimension_numbers = #tpu.dot_dimension_numbers<[1], [0], [0], [1], [0, 0, 1, 1], [], []>} : vector<128x4xf32>, vector<4x4xf32>, vector<128x4xf32> -> vector<128x4xf32>
    %78 = arith.addf %68, %77 : vector<128x4xf32>
    %c2_80 = arith.constant 2 : index
    %c0_81 = arith.constant 0 : index
    %c0_82 = arith.constant 0 : index
    %79 = vector.load %arg7[%c2_80, %c0_81, %c0_82] : memref<10x18x4xf32, #tpu.memory_space<vmem>>, vector<8x16x4xf32>
    %80 = vector.shape_cast %79 : vector<8x16x4xf32> to vector<128x4xf32>
    %c10 = arith.constant 10 : index
    %c0_83 = arith.constant 0 : index
    %c0_84 = arith.constant 0 : index
    %81 = vector.load %arg4[%c10, %c0_83, %c0_84] : memref<16x4x4xf32, #tpu.memory_space<vmem>>, vector<1x4x4xf32>
    %82 = vector.shape_cast %81 : vector<1x4x4xf32> to vector<4x4xf32>
    %cst_85 = arith.constant dense<0.000000e+00> : vector<128x4xf32>
    %83 = tpu.matmul %80, %82, %cst_85 {dimension_numbers = #tpu.dot_dimension_numbers<[1], [0], [0], [1], [0, 0, 1, 1], [], []>} : vector<128x4xf32>, vector<4x4xf32>, vector<128x4xf32> -> vector<128x4xf32>
    %84 = arith.addf %64, %83 : vector<128x4xf32>
    %c2_86 = arith.constant 2 : index
    %c1_87 = arith.constant 1 : index
    %c0_88 = arith.constant 0 : index
    %85 = vector.load %arg7[%c2_86, %c1_87, %c0_88] : memref<10x18x4xf32, #tpu.memory_space<vmem>>, vector<8x16x4xf32>
    %86 = vector.shape_cast %85 : vector<8x16x4xf32> to vector<128x4xf32>
    %c11 = arith.constant 11 : index
    %c0_89 = arith.constant 0 : index
    %c0_90 = arith.constant 0 : index
    %87 = vector.load %arg4[%c11, %c0_89, %c0_90] : memref<16x4x4xf32, #tpu.memory_space<vmem>>, vector<1x4x4xf32>
    %88 = vector.shape_cast %87 : vector<1x4x4xf32> to vector<4x4xf32>
    %cst_91 = arith.constant dense<0.000000e+00> : vector<128x4xf32>
    %89 = tpu.matmul %86, %88, %cst_91 {dimension_numbers = #tpu.dot_dimension_numbers<[1], [0], [0], [1], [0, 0, 1, 1], [], []>} : vector<128x4xf32>, vector<4x4xf32>, vector<128x4xf32> -> vector<128x4xf32>
    %90 = arith.addf %84, %89 : vector<128x4xf32>
    %c14 = arith.constant 14 : index
    %c0_92 = arith.constant 0 : index
    %c0_93 = arith.constant 0 : index
    %91 = vector.load %arg4[%c14, %c0_92, %c0_93] : memref<16x4x4xf32, #tpu.memory_space<vmem>>, vector<1x4x4xf32>
    %92 = vector.shape_cast %91 : vector<1x4x4xf32> to vector<4x4xf32>
    %cst_94 = arith.constant dense<0.000000e+00> : vector<128x4xf32>
    %93 = tpu.matmul %86, %92, %cst_94 {dimension_numbers = #tpu.dot_dimension_numbers<[1], [0], [0], [1], [0, 0, 1, 1], [], []>} : vector<128x4xf32>, vector<4x4xf32>, vector<128x4xf32> -> vector<128x4xf32>
    %94 = arith.addf %78, %93 : vector<128x4xf32>
    %c2_95 = arith.constant 2 : index
    %c2_96 = arith.constant 2 : index
    %c0_97 = arith.constant 0 : index
    %95 = vector.load %arg7[%c2_95, %c2_96, %c0_97] : memref<10x18x4xf32, #tpu.memory_space<vmem>>, vector<8x16x4xf32>
    %96 = vector.shape_cast %95 : vector<8x16x4xf32> to vector<128x4xf32>
    %c15 = arith.constant 15 : index
    %c0_98 = arith.constant 0 : index
    %c0_99 = arith.constant 0 : index
    %97 = vector.load %arg4[%c15, %c0_98, %c0_99] : memref<16x4x4xf32, #tpu.memory_space<vmem>>, vector<1x4x4xf32>
    %98 = vector.shape_cast %97 : vector<1x4x4xf32> to vector<4x4xf32>
    %cst_100 = arith.constant dense<0.000000e+00> : vector<128x4xf32>
    %99 = tpu.matmul %96, %98, %cst_100 {dimension_numbers = #tpu.dot_dimension_numbers<[1], [0], [0], [1], [0, 0, 1, 1], [], []>} : vector<128x4xf32>, vector<4x4xf32>, vector<128x4xf32> -> vector<128x4xf32>
    %100 = arith.addf %94, %99 : vector<128x4xf32>
    %101 = vector.shape_cast %14 : vector<4xf32> to vector<1x4xf32>
    %102 = vector.broadcast %101 : vector<1x4xf32> to vector<128x4xf32>
    %103 = arith.addf %56, %102 : vector<128x4xf32>
    %104 = vector.shape_cast %103 : vector<128x4xf32> to vector<8x16x4xf32>
    %c0_101 = arith.constant 0 : index
    %c0_102 = arith.constant 0 : index
    %c0_103 = arith.constant 0 : index
    %c0_104 = arith.constant 0 : index
    %105 = vector.load %arg6[%c0_101, %c0_102, %c0_103, %c0_104] : memref<4x8x16x4xf32, #tpu.memory_space<vmem>>, vector<1x8x16x4xf32>
    %106 = vector.shape_cast %105 : vector<1x8x16x4xf32> to vector<8x16x4xf32>
    %107 = vector.shape_cast %104 : vector<8x16x4xf32> to vector<1x8x16x4xf32>
    tpu.vector_store %arg6[%c0_101, %c0_102, %c0_103, %c0_104], %107 {strides = array<i32>} : memref<4x8x16x4xf32, #tpu.memory_space<vmem>>, vector<1x8x16x4xf32>,
    %108 = vector.shape_cast %14 : vector<4xf32> to vector<1x4xf32>
    %109 = vector.broadcast %108 : vector<1x4xf32> to vector<128x4xf32>
    %110 = arith.addf %74, %109 : vector<128x4xf32>
    %111 = vector.shape_cast %110 : vector<128x4xf32> to vector<8x16x4xf32>
    %c1_105 = arith.constant 1 : index
    %c0_106 = arith.constant 0 : index
    %c0_107 = arith.constant 0 : index
    %c0_108 = arith.constant 0 : index
    %112 = vector.load %arg6[%c1_105, %c0_106, %c0_107, %c0_108] : memref<4x8x16x4xf32, #tpu.memory_space<vmem>>, vector<1x8x16x4xf32>
    %113 = vector.shape_cast %112 : vector<1x8x16x4xf32> to vector<8x16x4xf32>
    %114 = vector.shape_cast %111 : vector<8x16x4xf32> to vector<1x8x16x4xf32>
    tpu.vector_store %arg6[%c1_105, %c0_106, %c0_107, %c0_108], %114 {strides = array<i32>} : memref<4x8x16x4xf32, #tpu.memory_space<vmem>>, vector<1x8x16x4xf32>,
    %115 = vector.shape_cast %14 : vector<4xf32> to vector<1x4xf32>
    %116 = vector.broadcast %115 : vector<1x4xf32> to vector<128x4xf32>
    %117 = arith.addf %90, %116 : vector<128x4xf32>
    %118 = vector.shape_cast %117 : vector<128x4xf32> to vector<8x16x4xf32>
    %c2_109 = arith.constant 2 : index
    %c0_110 = arith.constant 0 : index
    %c0_111 = arith.constant 0 : index
    %c0_112 = arith.constant 0 : index
    %119 = vector.load %arg6[%c2_109, %c0_110, %c0_111, %c0_112] : memref<4x8x16x4xf32, #tpu.memory_space<vmem>>, vector<1x8x16x4xf32>
    %120 = vector.shape_cast %119 : vector<1x8x16x4xf32> to vector<8x16x4xf32>
    %121 = vector.shape_cast %118 : vector<8x16x4xf32> to vector<1x8x16x4xf32>
    tpu.vector_store %arg6[%c2_109, %c0_110, %c0_111, %c0_112], %121 {strides = array<i32>} : memref<4x8x16x4xf32, #tpu.memory_space<vmem>>, vector<1x8x16x4xf32>,
    %122 = vector.shape_cast %14 : vector<4xf32> to vector<1x4xf32>
    %123 = vector.broadcast %122 : vector<1x4xf32> to vector<128x4xf32>
    %124 = arith.addf %100, %123 : vector<128x4xf32>
    %125 = vector.shape_cast %124 : vector<128x4xf32> to vector<8x16x4xf32>
    %c3_113 = arith.constant 3 : index
    %c0_114 = arith.constant 0 : index
    %c0_115 = arith.constant 0 : index
    %c0_116 = arith.constant 0 : index
    %126 = vector.load %arg6[%c3_113, %c0_114, %c0_115, %c0_116] : memref<4x8x16x4xf32, #tpu.memory_space<vmem>>, vector<1x8x16x4xf32>
    %127 = vector.shape_cast %126 : vector<1x8x16x4xf32> to vector<8x16x4xf32>
    %128 = vector.shape_cast %125 : vector<8x16x4xf32> to vector<1x8x16x4xf32>
    tpu.vector_store %arg6[%c3_113, %c0_114, %c0_115, %c0_116], %128 {strides = array<i32>} : memref<4x8x16x4xf32, #tpu.memory_space<vmem>>, vector<1x8x16x4xf32>,
    return
  }
  func.func @transform_0(%arg0: i32, %arg1: i32) -> (i32, i32, i32, i32) {
    %c0_i32 = arith.constant 0 : i32
    %c0_i32_0 = arith.constant 0 : i32
    %c0_i32_1 = arith.constant 0 : i32
    return %arg0, %arg1, %c0_i32, %c0_i32_0 : i32, i32, i32, i32
  }
  func.func @transform_1(%arg0: i32, %arg1: i32) -> (i32, i32, i32, i32) {
    %c0_i32 = arith.constant 0 : i32
    %c0_i32_0 = arith.constant 0 : i32
    %c0_i32_1 = arith.constant 0 : i32
    return %arg0, %arg1, %c0_i32, %c0_i32_0 : i32, i32, i32, i32
  }
  func.func @transform_2(%arg0: i32, %arg1: i32) -> (i32, i32, i32) {
    %c0_i32 = arith.constant 0 : i32
    %c0_i32_0 = arith.constant 0 : i32
    %c0_i32_1 = arith.constant 0 : i32
    %c0_i32_2 = arith.constant 0 : i32
    return %c0_i32, %c0_i32_0, %c0_i32_1 : i32, i32, i32
  }
  func.func @transform_3(%arg0: i32, %arg1: i32) -> (i32, i32) {
    %c0_i32 = arith.constant 0 : i32
    %c0_i32_0 = arith.constant 0 : i32
    %c0_i32_1 = arith.constant 0 : i32
    return %c0_i32, %c0_i32_0 : i32, i32
  }
  func.func @transform_4(%arg0: i32, %arg1: i32) -> (i32, i32, i32, i32) {
    %c0_i32 = arith.constant 0 : i32
    %c0_i32_0 = arith.constant 0 : i32
    %c0_i32_1 = arith.constant 0 : i32
    return %arg0, %arg1, %c0_i32, %c0_i32_0 : i32, i32, i32, i32
  }
}

</mosaic_0001>

<bundles_post_ra>
// kernel: upsample_module_forward.1
= control target key start
LH: loop header
LB: loop body
LE: loop exit
PB: predicated region body
PF: predicated region fallthrough
CT: control target
= control target key end

     0   :  { %s5347_s15 = smov 0   ;;  %s5349_s16 = smov 0   ;;  %s6534_s0 = inlined_call_operand.vmem [shape: f32[2,16,18,4], index: 0, kind: input, shape index: {}]   ;;  %s6535_s1 = inlined_call_operand.vmem [shape: f32[2,4,18,4], index: 1, kind: input, shape index: {}]   ;;  %s6536_s2 = inlined_call_operand.vmem [shape: f32[16,4,4], index: 2, kind: input, shape index: {}]   ;;  %s6537_s3 = inlined_call_operand.vmem [shape: f32[1,4], index: 3, kind: input, shape index: {}]   ;;  %s6538_s4 = inlined_call_operand.vmem [shape: f32[8,16,16,4], index: 4, kind: output, shape index: {}]  }
   0x1   :  { %s5351_s17 = smov 0   ;;  %s5353_s18 = smov 0  }
   0x2   :  { %s5355_s19 = smov 0   ;;  %s5357_s20 = smov 0  }
   0x3   :  { %s5359_s21 = smov 0  }
   0x4 LB: > { %s23_s22 = sadd.s32 1, %s5312_s19  ;;  %s26_s23 = sadd.s32 1, %s5316_s20  ;;  %s5320_s21 = sphi %s5359_s21, %s14_s21   ;;  %s5316_s20 = sphi %s5357_s20, %s6545_s20   ;;  %s5312_s19 = sphi %s5355_s19, %s6544_s19   ;;  %s5308_s18 = sphi %s5353_s18, %s6543_s18   ;;  %s5304_s17 = sphi %s5351_s17, %s6542_s17   ;;  %s5300_s16 = sphi %s5349_s16, %s6541_s16   ;;  %s5296_s15 = sphi %s5347_s15, %s6540_s15  }
   0x5   : > { %p24_p0 = scmp.ge.s32.totalorder %s23_s22, 2  ;;  %s3967_s24 = sadd.s32 4294967295, %s5320_s21  }
   0x6   : > { %p143_p1 = scmp.ne.s32.totalorder %s5300_s16, %s5296_s15  ;;  %p144_p2 = scmp.eq.s32.totalorder %s3967_s24, 3 }
   0x7   : > { %s6547_s22 = smov (%p24_p0, %s23_s22), 0  ;;  %s6549_s23 = smov (!%p24_p0, %s26_s23), %s5316_s20 }
   0x8   : > { %s129_s25 = ssub.s32 %s5312_s19, %s6547_s22  ;;  %p28_p3 = scmp.ge.s32.totalorder %s6549_s23, 2 }
   0x9   : > { %p3971_p4 = scmp.ge.s32.totalorder %s5320_s21, 1  ;;  %p5393_p5 = por %p144_p2, %p143_p1 }
   0xa   : > { %p202_p6 = scmp.lt.s32.totalorder %s5320_s21, 5  ;;  %s6551_s23 = smov (%p28_p3, %s6549_s23), 0 }
   0xb   : > { %s128_s27 = ssub.s32 %s5316_s20, %s6551_s23  ;;  %s133_s29 = sadd.s32 1, %s5300_s16 }
   0xc   : > { %p203_p7 = pnand %p3971_p4, %p202_p6  ;;  %s130_s28 = sor.u32 %s129_s25, %s128_s27 }
   0xd   : > { %p131_p8 = scmp.eq.s32.totalorder %s130_s28, 0  ;;  %v3980_v0 = vld [vmem:[%s6536_s2 + $0x4] sm:$0xf] (!%p203_p7)  ;;  %vm415_vm0 = vcmask (!%p203_p7), 1043456   ;;  %v4016_v1 = vld [vmem:[%s6536_s2 + $0x14] sm:$0xf] (!%p203_p7) }
   0xe   : > { %206 = sbr.rel (%p203_p7) target bundleno = 531 (0x213), region = 36  ;;  %s3973_s9 = sshll.u32 (!%p203_p7), %s5304_s17, 3  ;;  %4598 = vmatprep.subr.msk.mxu0 (!%p203_p7), %vm415_vm0, %v3980_v0  ;;  %4650 = vmatprep.subr.msk.mxu1 (!%p203_p7), %vm415_vm0, %v4016_v1  ;;  %v5419_v2 = vld [vmem:[%s6536_s2] sm:$0xf] (!%p203_p7)  ;;  %v5427_v3 = vld [vmem:[%s6536_s2 + $0x10] sm:$0xf] (!%p203_p7) }
   0xf   : > { %s5404_s30 = scalar_select %p131_p8, %s5300_s16, %s133_s29  }
  0x10   : > { %p243_p9 = scmp.lt.s32.totalorder (!%p203_p7), %s5308_s18, 1  ;;  %p245_p10 = scmp.lt.s32.totalorder (!%p203_p7), %s3973_s9, 15  ;;  %4599 = vmatpush3.msk.msra.mxu0 (!%p203_p7), %vm415_vm0, %v3980_v0  ;;  %4651 = vmatpush3.msk.msra.mxu1 (!%p203_p7), %vm415_vm0, %v4016_v1  ;;  %vm269_vm1 = vcmask (!%p203_p7), 31744   ;;  %vm272_vm2 = vcmask (!%p203_p7), 25600   ;;  %v5509_v34 = vld [vmem:[%s6536_s2 + $0x8] sm:$0xf] (!%p203_p7) }
  0x11   : > { %s3975_s12 = sshll.u32 (!%p203_p7), %s5304_s17, 1  ;;  %4624 = vmatprep.subr.msk.mxu0 (!%p203_p7), %vm415_vm0, %v5419_v2  ;;  %4676 = vmatprep.subr.msk.mxu1 (!%p203_p7), %vm415_vm0, %v5427_v3  ;;  %v5514_v35 = vld [vmem:[%s6536_s2 + $0x18] sm:$0xf] (!%p203_p7) }
  0x12   : > { %p256_p11 = scmp.lt.s32.totalorder (!%p203_p7), %s3975_s12, 3 }
  0x15   : > { %s244_s24 = scalar_select %p243_p9, %s5308_s18, 1 }
  0x16   : > { %s6553_s9 = smov (!%p245_p10, %s3973_s9), 15  ;;  %s6555_s12 = smov (!%p256_p11, %s3975_s12), 3 }
  0x17   : > { %s5207_s25 = smul.u32 48, %s244_s24 }
  0x18   : > { %s5206_s27 = smul.u32 3, %s6553_s9 }
  0x19   : > { %s5209_s29 = smul.u32 12, %s244_s24 }
  0x1a   : > { %s249_s28 = sadd.s32 %s5207_s25, %s5206_s27  ;;  %s5208_s6 = smul.u32 3, %s6555_s12 }
  0x1b   : > { %s3974_s5 = sshll.u32 %s249_s28, 3 }
  0x1c   : > { %s5437_s10 = scalar_lea.vmem %s6534_s0, %s3974_s5  ;;  %s260_s11 = sadd.s32 %s5209_s29, %s5208_s6 }
  0x1d   : > { %v274_v4 = vld [vmem:[%s5437_s10] sm:$0xff]  ;;  %v275_v5 = vld [vmem:[%s5437_s10 + $0x8] sm:$0xff]  ;;  %v276_v6 = vld [vmem:[%s5437_s10 + $0x10] sm:$0x3]  ;;  %s3976_s9 = sshll.u32 %s260_s11, 3 }
  0x1e   : > { %299 = vst.msk [vmem:[#allocation2 + $0x18] sm:$0xff] %vm269_vm1, %v274_v4  ;;  %300 = vst.msk [vmem:[#allocation2 + $0x20] sm:$0xff] %vm269_vm1, %v275_v5  ;;  %v277_v7 = vld [vmem:[%s5437_s10 + $0x18] sm:$0xff]  ;;  %v278_v8 = vld [vmem:[%s5437_s10 + $0x20] sm:$0xff]  ;;  %s5451_s14 = scalar_lea.vmem %s6535_s1, %s3976_s9 }
  0x1f   : > { %301 = vst.msk [vmem:[#allocation2 + $0x28] sm:$0x3] %vm272_vm2, %v276_v6  ;;  %v279_v9 = vld [vmem:[%s5437_s10 + $0x28] sm:$0x3]  ;;  %v280_v10 = vld [vmem:[%s5437_s10 + $0x30] sm:$0xff]  ;;  %v281_v11 = vld [vmem:[%s5437_s10 + $0x38] sm:$0xff] }
  0x20   : > { %302 = vst.msk [vmem:[#allocation2 + $0x30] sm:$0xff] %vm269_vm1, %v277_v7  ;;  %303 = vst.msk [vmem:[#allocation2 + $0x38] sm:$0xff] %vm269_vm1, %v278_v8  ;;  %v282_v12 = vld [vmem:[%s5437_s10 + $0x40] sm:$0x3]  ;;  %v267_v14 = vld [vmem:[%s5451_s14 + $0x8] sm:$0xff] }
  0x21   : > { %304 = vst.msk [vmem:[#allocation2 + $0x40] sm:$0x3] %vm272_vm2, %v279_v9  ;;  %v266_v13 = vld [vmem:[%s5451_s14] sm:$0xff]  ;;  %v268_v15 = vld [vmem:[%s5451_s14 + $0x10] sm:$0x3]  ;;  %v283_v16 = vld [vmem:[%s5437_s10 + $0x48] sm:$0xff] }
  0x22   : > { %305 = vst.msk [vmem:[#allocation2 + $0x48] sm:$0xff] %vm269_vm1, %v280_v10  ;;  %306 = vst.msk [vmem:[#allocation2 + $0x50] sm:$0xff] %vm269_vm1, %v281_v11  ;;  %v284_v17 = vld [vmem:[%s5437_s10 + $0x50] sm:$0xff]  ;;  %v285_v18 = vld [vmem:[%s5437_s10 + $0x58] sm:$0x3] }
  0x23   : > { %307 = vst.msk [vmem:[#allocation2 + $0x58] sm:$0x3] %vm272_vm2, %v282_v12  ;;  %273 = vst.msk [vmem:[#allocation2 + $0x10] sm:$0x3] %vm272_vm2, %v268_v15  ;;  %v286_v19 = vld [vmem:[%s5437_s10 + $0x60] sm:$0xff]  ;;  %v287_v20 = vld [vmem:[%s5437_s10 + $0x68] sm:$0xff] }
  0x24   : > { %270 = vst.msk [vmem:[#allocation2] sm:$0xff] %vm269_vm1, %v266_v13  ;;  %271 = vst.msk [vmem:[#allocation2 + $0x8] sm:$0xff] %vm269_vm1, %v267_v14  ;;  %v288_v21 = vld [vmem:[%s5437_s10 + $0x70] sm:$0x3]  ;;  %v289_v22 = vld [vmem:[%s5437_s10 + $0x78] sm:$0xff] }
  0x25   : > { %308 = vst.msk [vmem:[#allocation2 + $0x60] sm:$0xff] %vm269_vm1, %v283_v16  ;;  %309 = vst.msk [vmem:[#allocation2 + $0x68] sm:$0xff] %vm269_vm1, %v284_v17  ;;  %v290_v23 = vld [vmem:[%s5437_s10 + $0x80] sm:$0xff]  ;;  %v291_v24 = vld [vmem:[%s5437_s10 + $0x88] sm:$0x3] }
  0x26   : > { %310 = vst.msk [vmem:[#allocation2 + $0x70] sm:$0x3] %vm272_vm2, %v285_v18  ;;  %313 = vst.msk [vmem:[#allocation2 + $0x88] sm:$0x3] %vm272_vm2, %v288_v21  ;;  %v292_v25 = vld [vmem:[%s5437_s10 + $0x90] sm:$0xff]  ;;  %v293_v26 = vld [vmem:[%s5437_s10 + $0x98] sm:$0xff] }
  0x27   : > { %311 = vst.msk [vmem:[#allocation2 + $0x78] sm:$0xff] %vm269_vm1, %v286_v19  ;;  %312 = vst.msk [vmem:[#allocation2 + $0x80] sm:$0xff] %vm269_vm1, %v287_v20  ;;  %v294_v27 = vld [vmem:[%s5437_s10 + $0xa0] sm:$0x3]  ;;  %v5522_v37 = vld [vmem:[#allocation2 + $0x22] sm:$0xff] }
  0x28   : > { %314 = vst.msk [vmem:[#allocation2 + $0x90] sm:$0xff] %vm269_vm1, %v289_v22  ;;  %315 = vst.msk [vmem:[#allocation2 + $0x98] sm:$0xff] %vm269_vm1, %v290_v23  ;;  %v5499_v32 = vld [vmem:[#allocation2 + $0x19] sm:$0xff]  ;;  %v5520_v36 = vld [vmem:[#allocation2 + $0x21] sm:$0xff] }
  0x29   : > { %316 = vst.msk [vmem:[#allocation2 + $0xa0] sm:$0x3] %vm272_vm2, %v291_v24  ;;  %319 = vst.msk [vmem:[#allocation2 + $0xb8] sm:$0x3] %vm272_vm2, %v294_v27  ;;  %v5501_v33 = vld [vmem:[#allocation2 + $0x1a] sm:$0xff]  ;;  %v5528_v38 = vld [vmem:[#allocation2 + $0x31] sm:$0xff] }
  0x2a   : > { %317 = vst.msk [vmem:[#allocation2 + $0xa8] sm:$0xff] %vm269_vm1, %v292_v25  ;;  %318 = vst.msk [vmem:[#allocation2 + $0xb0] sm:$0xff] %vm269_vm1, %v293_v26  ;;  %v5530_v39 = vld [vmem:[#allocation2 + $0x32] sm:$0xff]  ;;  %v5546_v41 = vld [vmem:[#allocation2 + $0x3a] sm:$0xff] }
  0x2b   : > { %v5492_v28 = vld [vmem:[#allocation2 + $0x1] sm:$0xff]  ;;  %v5494_v30 = vld [vmem:[#allocation2 + $0x9] sm:$0xff]  ;;  %v5544_v40 = vld [vmem:[#allocation2 + $0x39] sm:$0xff] }
  0x2c   : > { %v762_v29 = vld [vmem:[#allocation2 + $0x2] sm:$0xff]  ;;  %4600 = vmatprep.mubr.msk.f32.mxu0 %vm269_vm1, %v5492_v28  ;;  %v763_v31 = vld [vmem:[#allocation2 + $0xa] sm:$0xff]  ;;  %v5562_v45 = vld [vmem:[#allocation2 + $0x52] sm:$0xff] }
  0x2d   : > { %4652 = vmatprep.mubr.msk.f32.mxu1 %vm269_vm1, %v762_v29  ;;  %4601 = vmatmul.mubr.msk.f32.vlgmr.msra.gmra.mrb[0].mxu0 %vm269_vm1, %v5494_v30  ;;  %v5548_v42 = vld [vmem:[#allocation2 + $0x49] sm:$0xff]  ;;  %v5560_v44 = vld [vmem:[#allocation2 + $0x51] sm:$0xff]  ;;  %v5564_v46 = vld [vmem:[#allocation2 + $0x61] sm:$0xff] }
  0x2e   : > { %4653 = vmatmul.mubr.msk.f32.vlgmr.msra.gmra.mrb[0].mxu1 %vm269_vm1, %v763_v31  ;;  %4625 = vmatpush3.msk.msra.mxu0 %vm415_vm0, %v5419_v2  ;;  %v5550_v43 = vld [vmem:[#allocation2 + $0x4a] sm:$0xff]  ;;  %v5566_v47 = vld [vmem:[#allocation2 + $0x62] sm:$0xff]  ;;  %v297_v50 = vld [vmem:[%s5437_s10 + $0xb8] sm:$0x3] }
  0x2f   : > { %4677 = vmatpush3.msk.msra.mxu1 %vm415_vm0, %v5427_v3  ;;  %4603 = vmatprep.mubr.msk.f32.mxu0 %vm269_vm1, %v5499_v32  ;;  %v295_v48 = vld [vmem:[%s5437_s10 + $0xa8] sm:$0xff]  ;;  %v296_v49 = vld [vmem:[%s5437_s10 + $0xb0] sm:$0xff]  ;;  %322 = vst.msk [vmem:[#allocation2 + $0xd0] sm:$0x3] %vm272_vm2, %v297_v50  ;;  %v5586_v53 = vld [vmem:[#allocation2 + $0x79] sm:$0xff]  ;;  %s239_s10 = sand.u32 1, %s5296_s15  }
  0x30   : > { %4655 = vmatprep.mubr.msk.f32.mxu1 %vm269_vm1, %v5501_v33  ;;  %4702 = vmatprep.subr.msk.mxu0 %vm415_vm0, %v5509_v34  ;;  %320 = vst.msk [vmem:[#allocation2 + $0xc0] sm:$0xff] %vm269_vm1, %v295_v48  ;;  %321 = vst.msk [vmem:[#allocation2 + $0xc8] sm:$0xff] %vm269_vm1, %v296_v49  ;;  %v5582_v51 = vld [vmem:[#allocation2 + $0x69] sm:$0xff]  ;;  %v5588_v54 = vld [vmem:[#allocation2 + $0x7a] sm:$0xff]  ;;  %s3972_s11 = sshll.u32 %s239_s10, 9  ;;  %s4324_s15 = sshll.u32 (%p5393_p5), %s5304_s17, 4 }
  0x31   : > { %4754 = vmatprep.subr.msk.mxu1 %vm415_vm0, %v5514_v35  ;;  %4604 = vmatmul.mubr.msk.f32.gmra.mrb[2].mxu0 %vm269_vm1, %v5520_v36  ;;  %v5584_v52 = vld [vmem:[#allocation2 + $0x6a] sm:$0xff]  ;;  %v5598_v55 = vld [vmem:[#allocation2 + $0x81] sm:$0xff]  ;;  %v5604_v58 = vld [vmem:[#allocation2 + $0x92] sm:$0xff]  ;;  %s6184_s13 = scalar_lea.vmem [#allocation3], %s3972_s11 }
  0x32   : > { %4656 = vmatmul.mubr.msk.f32.gmra.mrb[2].mxu1 %vm269_vm1, %v5522_v37  ;;  %4606 = vmatprep.mubr.msk.f32.mxu0 %vm269_vm1, %v5528_v38  ;;  %v5600_v56 = vld [vmem:[#allocation2 + $0x82] sm:$0xff]  ;;  %v5602_v57 = vld [vmem:[#allocation2 + $0x91] sm:$0xff]  ;;  %v5614_v59 = vld [vmem:[#allocation2 + $0x99] sm:$0xff] }
  0x33   : > { %4658 = vmatprep.mubr.msk.f32.mxu1 %vm269_vm1, %v5530_v39  ;;  %v5616_v60 = vld [vmem:[#allocation2 + $0x9a] sm:$0xff]  ;;  %v5618_v61 = vld [vmem:[#allocation2 + $0xa9] sm:$0xff]  ;;  %v5630_v63 = vld [vmem:[#allocation2 + $0xb1] sm:$0xff] }
  0x34   : > { %v5620_v62 = vld [vmem:[#allocation2 + $0xaa] sm:$0xff]  ;;  %v5632_v0 = vld [vmem:[#allocation2 + $0xb2] sm:$0xff]  ;;  %v332_v1 = vld [vmem:[#allocation2] sm:$0xff] }
  0x35   : > { %4607 = vmatmul.mubr.msk.f32.gmra.mrb[4].mxu0 %vm269_vm1, %v5544_v40  ;;  %v333_v2 = vld [vmem:[#allocation2 + $0x8] sm:$0xff]  ;;  %v5641_v3 = vld [vmem:[#allocation2 + $0x18] sm:$0xff]  ;;  %v4106_v5 = vld [vmem:[%s6536_s2 + $0x24] sm:$0xf] }
  0x36   : > { %4659 = vmatmul.mubr.msk.f32.gmra.mrb[4].mxu1 %vm269_vm1, %v5546_v41  ;;  %4609 = vmatprep.mubr.msk.f32.mxu0 %vm269_vm1, %v5548_v42  ;;  %v4070_v4 = vld [vmem:[%s6536_s2 + $0xc] sm:$0xf]  ;;  %v5656_v6 = vld [vmem:[#allocation2 + $0x20] sm:$0xff]  ;;  %v5662_v7 = vld [vmem:[#allocation2 + $0x30] sm:$0xff] }
  0x37   : > { %4661 = vmatprep.mubr.msk.f32.mxu1 %vm269_vm1, %v5550_v43  ;;  %v5674_v8 = vld [vmem:[#allocation2 + $0x38] sm:$0xff]  ;;  %v5676_v9 = vld [vmem:[#allocation2 + $0x48] sm:$0xff]  ;;  %v5686_v10 = vld [vmem:[#allocation2 + $0x50] sm:$0xff] }
  0x38   : > { %v5688_v11 = vld [vmem:[#allocation2 + $0x60] sm:$0xff]  ;;  %v5698_v12 = vld [vmem:[#allocation2 + $0x68] sm:$0xff]  ;;  %v5700_v13 = vld [vmem:[#allocation2 + $0x78] sm:$0xff] }
  0x39   : > { %4610 = vmatmul.mubr.msk.f32.gmra.mrb[6].mxu0 %vm269_vm1, %v5560_v44  ;;  %v5710_v14 = vld [vmem:[#allocation2 + $0x80] sm:$0xff]  ;;  %v5712_v15 = vld [vmem:[#allocation2 + $0x90] sm:$0xff]  ;;  %v5722_v16 = vld [vmem:[#allocation2 + $0x98] sm:$0xff] }
  0x3a   : > { %4662 = vmatmul.mubr.msk.f32.gmra.mrb[6].mxu1 %vm269_vm1, %v5562_v45  ;;  %4612 = vmatprep.mubr.msk.f32.mxu0 %vm269_vm1, %v5564_v46  ;;  %v5724_v17 = vld [vmem:[#allocation2 + $0xa8] sm:$0xff]  ;;  %v5734_v18 = vld [vmem:[#allocation2 + $0xb0] sm:$0xff]  ;;  %v4069_v19 = vld [vmem:[%s6536_s2 + $0x20] sm:$0xf] }
  0x3b   : > { %4664 = vmatprep.mubr.msk.f32.mxu1 %vm269_vm1, %v5566_v47  ;;  %v4160_v20 = vld [vmem:[%s6536_s2 + $0x34] sm:$0xf]  ;;  %v3977_v21 = vld [vmem:[%s5451_s14 + $0x18] sm:$0xff]  ;;  %v3978_v22 = vld [vmem:[%s5451_s14 + $0x20] sm:$0xff] }
  0x3c   : > { %328 = vst.msk [vmem:[#allocation2 + $0xd8] sm:$0xff] %vm269_vm1, %v3977_v21  ;;  %329 = vst.msk [vmem:[#allocation2 + $0xe0] sm:$0xff] %vm269_vm1, %v3978_v22  ;;  %v3979_v23 = vld [vmem:[%s5451_s14 + $0x28] sm:$0x3]  ;;  %v5808_v24 = vld [vmem:[#allocation2 + $0xc0] sm:$0xff]  ;;  %s4325_s14 = sshll.u32 (%p5393_p5), %s5308_s18, 7 }
  0x3d   : > { %4613 = vmatmul.mubr.msk.f32.gmra.mrb[8].mxu0 %vm269_vm1, %v5582_v51  ;;  %330 = vst.msk [vmem:[#allocation2 + $0xe8] sm:$0x3] %vm272_vm2, %v3979_v23  ;;  %v5810_v25 = vld [vmem:[#allocation2 + $0xc1] sm:$0xff]  ;;  %v5822_v27 = vld [vmem:[#allocation2 + $0xc9] sm:$0xff]  ;;  %v4231_v31 = vld [vmem:[%s6536_s2 + $0x38] sm:$0xf]  ;;  %s3585_s26 = sadd.s32 (%p5393_p5), %s4325_s14, %s4324_s15 }
  0x3e   : > { %4665 = vmatmul.mubr.msk.f32.gmra.mrb[8].mxu1 %vm269_vm1, %v5584_v52  ;;  %4615 = vmatprep.mubr.msk.f32.mxu0 %vm269_vm1, %v5586_v53  ;;  %v5820_v26 = vld [vmem:[#allocation2 + $0xc8] sm:$0xff]  ;;  %v4141_v29 = vld [vmem:[%s6536_s2 + $0x30] sm:$0xf]  ;;  %v4249_v49 = vld [vmem:[%s6536_s2 + $0x3c] sm:$0xf]  ;;  %s4321_s24 = sshll.u32 (%p5393_p5), %s3585_s26, 3 }
  0x3f   : > { %4667 = vmatprep.mubr.msk.f32.mxu1 %vm269_vm1, %v5588_v54  ;;  %v4213_v48 = vld [vmem:[%s6536_s2 + $0x2c] sm:$0xf]  ;;  %s6392_s28 = scalar_lea.vmem (%p5393_p5), %s6538_s4, %s4321_s24 }
  0x41   : > { %4616 = vmatmul.mubr.msk.f32.gmra.mrb[10].mxu0 %vm269_vm1, %v5598_v55 }
  0x42   : > { %4668 = vmatmul.mubr.msk.f32.gmra.mrb[10].mxu1 %vm269_vm1, %v5600_v56  ;;  %4618 = vmatprep.mubr.msk.f32.mxu0 %vm269_vm1, %v5602_v57 }
  0x43   : > { %4670 = vmatprep.mubr.msk.f32.mxu1 %vm269_vm1, %v5604_v58 }
  0x45   : > { %4619 = vmatmul.mubr.msk.f32.gmra.mrb[12].mxu0 %vm269_vm1, %v5614_v59 }
  0x46   : > { %4671 = vmatmul.mubr.msk.f32.gmra.mrb[12].mxu1 %vm269_vm1, %v5616_v60  ;;  %4621 = vmatprep.mubr.msk.f32.mxu0 %vm269_vm1, %v5618_v61 }
  0x47   : > { %4673 = vmatprep.mubr.msk.f32.mxu1 %vm269_vm1, %v5620_v62 }
  0x49   : > { %4622 = vmatmul.mubr.msk.f32.gmra.mrb[14].mxu0 %vm269_vm1, %v5630_v63 }
  0x4a   : > { %4674 = vmatmul.mubr.msk.f32.gmra.mrb[14].mxu1 %vm269_vm1, %v5632_v0  ;;  %4626 = vmatprep.mubr.msk.f32.mxu0 %vm269_vm1, %v332_v1 }
  0x4b   : > { %4678 = vmatprep.mubr.msk.f32.mxu1 %vm269_vm1, %v5492_v28  ;;  %v4142_v28 = vld [vmem:[%s6536_s2 + $0x1c] sm:$0xf] }
  0x4d   : > { %4627 = vmatmul.mubr.msk.f32.vlgmr.msra.gmra.mrb[0].mxu0 %vm269_vm1, %v333_v2 }
  0x4e   : > { %4679 = vmatmul.mubr.msk.f32.vlgmr.msra.gmra.mrb[0].mxu1 %vm269_vm1, %v5494_v30  ;;  %4703 = vmatpush3.msk.msra.mxu0 %vm415_vm0, %v5509_v34  ;;  %v4195_v30 = vld [vmem:[%s6536_s2 + $0x28] sm:$0xf] }
  0x4f   : > { %4755 = vmatpush3.msk.msra.mxu1 %vm415_vm0, %v5514_v35  ;;  %4629 = vmatprep.mubr.msk.f32.mxu0 %vm269_vm1, %v5641_v3  ;;  %v5964_v34 = vld [vmem:[#allocation2 + $0xc2] sm:$0xff]  ;;  %v5974_v35 = vld [vmem:[#allocation2 + $0xca] sm:$0xff] }
  0x50   : > { %4681 = vmatprep.mubr.msk.f32.mxu1 %vm269_vm1, %v5499_v32  ;;  %4728 = vmatprep.subr.msk.mxu0 %vm415_vm0, %v4070_v4 }
  0x51   : > { %4780 = vmatprep.subr.msk.mxu1 %vm415_vm0, %v4106_v5  ;;  %4630 = vmatmul.mubr.msk.f32.gmra.mrb[2].mxu0 %vm269_vm1, %v5656_v6 }
  0x52   : > { %4682 = vmatmul.mubr.msk.f32.gmra.mrb[2].mxu1 %vm269_vm1, %v5520_v36  ;;  %4632 = vmatprep.mubr.msk.f32.mxu0 %vm269_vm1, %v5662_v7 }
  0x53   : > { %4684 = vmatprep.mubr.msk.f32.mxu1 %vm269_vm1, %v5528_v38 }
  0x55   : > { %4633 = vmatmul.mubr.msk.f32.gmra.mrb[4].mxu0 %vm269_vm1, %v5674_v8 }
  0x56   : > { %4685 = vmatmul.mubr.msk.f32.gmra.mrb[4].mxu1 %vm269_vm1, %v5544_v40  ;;  %4635 = vmatprep.mubr.msk.f32.mxu0 %vm269_vm1, %v5676_v9 }
  0x57   : > { %4687 = vmatprep.mubr.msk.f32.mxu1 %vm269_vm1, %v5548_v42 }
  0x59   : > { %4636 = vmatmul.mubr.msk.f32.gmra.mrb[6].mxu0 %vm269_vm1, %v5686_v10 }
  0x5a   : > { %4688 = vmatmul.mubr.msk.f32.gmra.mrb[6].mxu1 %vm269_vm1, %v5560_v44  ;;  %4638 = vmatprep.mubr.msk.f32.mxu0 %vm269_vm1, %v5688_v11 }
  0x5b   : > { %4690 = vmatprep.mubr.msk.f32.mxu1 %vm269_vm1, %v5564_v46 }
  0x5d   : > { %4639 = vmatmul.mubr.msk.f32.gmra.mrb[8].mxu0 %vm269_vm1, %v5698_v12 }
  0x5e   : > { %4691 = vmatmul.mubr.msk.f32.gmra.mrb[8].mxu1 %vm269_vm1, %v5582_v51  ;;  %4641 = vmatprep.mubr.msk.f32.mxu0 %vm269_vm1, %v5700_v13 }
  0x5f   : > { %4693 = vmatprep.mubr.msk.f32.mxu1 %vm269_vm1, %v5586_v53 }
  0x61   : > { %4642 = vmatmul.mubr.msk.f32.gmra.mrb[10].mxu0 %vm269_vm1, %v5710_v14 }
  0x62   : > { %4694 = vmatmul.mubr.msk.f32.gmra.mrb[10].mxu1 %vm269_vm1, %v5598_v55  ;;  %4644 = vmatprep.mubr.msk.f32.mxu0 %vm269_vm1, %v5712_v15 }
  0x63   : > { %4696 = vmatprep.mubr.msk.f32.mxu1 %vm269_vm1, %v5602_v57 }
  0x65   : > { %4645 = vmatmul.mubr.msk.f32.gmra.mrb[12].mxu0 %vm269_vm1, %v5722_v16 }
  0x66   : > { %4697 = vmatmul.mubr.msk.f32.gmra.mrb[12].mxu1 %vm269_vm1, %v5614_v59  ;;  %4647 = vmatprep.mubr.msk.f32.mxu0 %vm269_vm1, %v5724_v17 }
  0x67   : > { %4699 = vmatprep.mubr.msk.f32.mxu1 %vm269_vm1, %v5618_v61 }
  0x69   : > { %4648 = vmatmul.mubr.msk.f32.gmra.mrb[14].mxu0 %vm269_vm1, %v5734_v18 }
  0x6a   : > { %4700 = vmatmul.mubr.msk.f32.gmra.mrb[14].mxu1 %vm269_vm1, %v5630_v63  ;;  %4704 = vmatprep.mubr.msk.f32.mxu0 %vm269_vm1, %v5641_v3 }
  0x6b   : > { %4756 = vmatprep.mubr.msk.f32.mxu1 %vm269_vm1, %v5499_v32 }
  0x6d   : > { %4705 = vmatmul.mubr.msk.f32.vlgmr.msra.gmra.mrb[0].mxu0 %vm269_vm1, %v5656_v6 }
  0x6e   : > { %4757 = vmatmul.mubr.msk.f32.vlgmr.msra.gmra.mrb[0].mxu1 %vm269_vm1, %v5520_v36  ;;  %4729 = vmatpush3.msk.msra.mxu0 %vm415_vm0, %v4070_v4 }
  0x6f   : > { %4781 = vmatpush3.msk.msra.mxu1 %vm415_vm0, %v4106_v5  ;;  %4707 = vmatprep.mubr.msk.f32.mxu0 %vm269_vm1, %v5662_v7 }
  0x70   : > { %4759 = vmatprep.mubr.msk.f32.mxu1 %vm269_vm1, %v5528_v38  ;;  %4806 = vmatprep.subr.msk.mxu1 %vm415_vm0, %v4069_v19 }
  0x71   : > { %4858 = vmatprep.subr.msk.mxu0 %vm415_vm0, %v4160_v20  ;;  %4708 = vmatmul.mubr.msk.f32.gmra.mrb[2].mxu0 %vm269_vm1, %v5674_v8 }
  0x72   : > { %4760 = vmatmul.mubr.msk.f32.gmra.mrb[2].mxu1 %vm269_vm1, %v5544_v40  ;;  %4710 = vmatprep.mubr.msk.f32.mxu0 %vm269_vm1, %v5676_v9 }
  0x73   : > { %4762 = vmatprep.mubr.msk.f32.mxu1 %vm269_vm1, %v5548_v42 }
  0x75   : > { %4711 = vmatmul.mubr.msk.f32.gmra.mrb[4].mxu0 %vm269_vm1, %v5686_v10 }
  0x76   : > { %4763 = vmatmul.mubr.msk.f32.gmra.mrb[4].mxu1 %vm269_vm1, %v5560_v44  ;;  %4713 = vmatprep.mubr.msk.f32.mxu0 %vm269_vm1, %v5688_v11 }
  0x77   : > { %4765 = vmatprep.mubr.msk.f32.mxu1 %vm269_vm1, %v5564_v46 }
  0x79   : > { %4714 = vmatmul.mubr.msk.f32.gmra.mrb[6].mxu0 %vm269_vm1, %v5698_v12 }
  0x7a   : > { %4766 = vmatmul.mubr.msk.f32.gmra.mrb[6].mxu1 %vm269_vm1, %v5582_v51  ;;  %4716 = vmatprep.mubr.msk.f32.mxu0 %vm269_vm1, %v5700_v13 }
  0x7b   : > { %4768 = vmatprep.mubr.msk.f32.mxu1 %vm269_vm1, %v5586_v53 }
  0x7d   : > { %4717 = vmatmul.mubr.msk.f32.gmra.mrb[8].mxu0 %vm269_vm1, %v5710_v14 }
  0x7e   : > { %4769 = vmatmul.mubr.msk.f32.gmra.mrb[8].mxu1 %vm269_vm1, %v5598_v55  ;;  %4719 = vmatprep.mubr.msk.f32.mxu0 %vm269_vm1, %v5712_v15 }
  0x7f   : > { %4771 = vmatprep.mubr.msk.f32.mxu1 %vm269_vm1, %v5602_v57 }
  0x81   : > { %4720 = vmatmul.mubr.msk.f32.gmra.mrb[10].mxu0 %vm269_vm1, %v5722_v16 }
  0x82   : > { %4772 = vmatmul.mubr.msk.f32.gmra.mrb[10].mxu1 %vm269_vm1, %v5614_v59  ;;  %4722 = vmatprep.mubr.msk.f32.mxu0 %vm269_vm1, %v5724_v17 }
  0x83   : > { %4774 = vmatprep.mubr.msk.f32.mxu1 %vm269_vm1, %v5618_v61 }
  0x85   : > { %4723 = vmatmul.mubr.msk.f32.gmra.mrb[12].mxu0 %vm269_vm1, %v5734_v18 }
  0x86   : > { %4775 = vmatmul.mubr.msk.f32.gmra.mrb[12].mxu1 %vm269_vm1, %v5630_v63  ;;  %4725 = vmatprep.mubr.msk.f32.mxu0 %vm269_vm1, %v5808_v24 }
  0x87   : > { %4777 = vmatprep.mubr.msk.f32.mxu1 %vm269_vm1, %v5810_v25 }
  0x89   : > { %4726 = vmatmul.mubr.msk.f32.gmra.mrb[14].mxu0 %vm269_vm1, %v5820_v26 }
  0x8a   : > { %4778 = vmatmul.mubr.msk.f32.gmra.mrb[14].mxu1 %vm269_vm1, %v5822_v27  ;;  %4730 = vmatprep.mubr.msk.f32.mxu0 %vm269_vm1, %v5499_v32 }
  0x8b   : > { %4782 = vmatprep.mubr.msk.f32.mxu1 %vm269_vm1, %v5499_v32 }
  0x8d   : > { %4731 = vmatmul.mubr.msk.f32.vlgmr.msra.gmra.mrb[0].mxu0 %vm269_vm1, %v5520_v36 }
  0x8e   : > { %4783 = vmatmul.mubr.msk.f32.vlgmr.msra.gmra.mrb[16].mxu1 %vm269_vm1, %v5520_v36  ;;  %4859 = vmatpush3.msk.msra.mxu0 %vm415_vm0, %v4160_v20 }
  0x8f   : > { %4807 = vmatpush3.msk.msra.mxu1 %vm415_vm0, %v4069_v19  ;;  %4733 = vmatprep.mubr.msk.f32.mxu0 %vm269_vm1, %v5528_v38 }
  0x90   : > { %4785 = vmatprep.mubr.msk.f32.mxu1 %vm269_vm1, %v5528_v38  ;;  %4832 = vmatprep.subr.msk.mxu1 %vm415_vm0, %v4142_v28 }
  0x91   : > { %4884 = vmatprep.subr.msk.mxu0 %vm415_vm0, %v4141_v29  ;;  %4734 = vmatmul.mubr.msk.f32.gmra.mrb[2].mxu0 %vm269_vm1, %v5544_v40 }
  0x92   : > { %4786 = vmatmul.mubr.msk.f32.gmra.mrb[18].mxu1 %vm269_vm1, %v5544_v40  ;;  %4736 = vmatprep.mubr.msk.f32.mxu0 %vm269_vm1, %v5548_v42 }
  0x93   : > { %4788 = vmatprep.mubr.msk.f32.mxu1 %vm269_vm1, %v5548_v42 }
  0x95   : > { %4737 = vmatmul.mubr.msk.f32.gmra.mrb[4].mxu0 %vm269_vm1, %v5560_v44 }
  0x96   : > { %4789 = vmatmul.mubr.msk.f32.gmra.mrb[20].mxu1 %vm269_vm1, %v5560_v44  ;;  %4739 = vmatprep.mubr.msk.f32.mxu0 %vm269_vm1, %v5564_v46 }
  0x97   : > { %4791 = vmatprep.mubr.msk.f32.mxu1 %vm269_vm1, %v5564_v46 }
  0x99   : > { %4740 = vmatmul.mubr.msk.f32.gmra.mrb[6].mxu0 %vm269_vm1, %v5582_v51 }
  0x9a   : > { %4792 = vmatmul.mubr.msk.f32.gmra.mrb[22].mxu1 %vm269_vm1, %v5582_v51  ;;  %4742 = vmatprep.mubr.msk.f32.mxu0 %vm269_vm1, %v5586_v53 }
  0x9b   : > { %4794 = vmatprep.mubr.msk.f32.mxu1 %vm269_vm1, %v5586_v53 }
  0x9d   : > { %4743 = vmatmul.mubr.msk.f32.gmra.mrb[8].mxu0 %vm269_vm1, %v5598_v55 }
  0x9e   : > { %4795 = vmatmul.mubr.msk.f32.gmra.mrb[24].mxu1 %vm269_vm1, %v5598_v55  ;;  %4745 = vmatprep.mubr.msk.f32.mxu0 %vm269_vm1, %v5602_v57 }
  0x9f   : > { %4797 = vmatprep.mubr.msk.f32.mxu1 %vm269_vm1, %v5602_v57 }
  0xa1   : > { %4746 = vmatmul.mubr.msk.f32.gmra.mrb[10].mxu0 %vm269_vm1, %v5614_v59 }
  0xa2   : > { %4798 = vmatmul.mubr.msk.f32.gmra.mrb[26].mxu1 %vm269_vm1, %v5614_v59  ;;  %4748 = vmatprep.mubr.msk.f32.mxu0 %vm269_vm1, %v5618_v61 }
  0xa3   : > { %4800 = vmatprep.mubr.msk.f32.mxu1 %vm269_vm1, %v5618_v61 }
  0xa5   : > { %4749 = vmatmul.mubr.msk.f32.gmra.mrb[12].mxu0 %vm269_vm1, %v5630_v63 }
  0xa6   : > { %4801 = vmatmul.mubr.msk.f32.gmra.mrb[28].mxu1 %vm269_vm1, %v5630_v63  ;;  %4751 = vmatprep.mubr.msk.f32.mxu0 %vm269_vm1, %v5810_v25 }
  0xa7   : > { %4803 = vmatprep.mubr.msk.f32.mxu1 %vm269_vm1, %v5810_v25 }
  0xa9   : > { %4752 = vmatmul.mubr.msk.f32.gmra.mrb[14].mxu0 %vm269_vm1, %v5822_v27 }
  0xaa   : > { %4804 = vmatmul.mubr.msk.f32.gmra.mrb[30].mxu1 %vm269_vm1, %v5822_v27  ;;  %4860 = vmatprep.mubr.msk.f32.mxu0 %vm269_vm1, %v5501_v33 }
  0xab   : > { %4808 = vmatprep.mubr.msk.f32.mxu1 %vm269_vm1, %v5641_v3 }
  0xad   : > { %4861 = vmatmul.mubr.msk.f32.vlgmr.msra.gmra.mrb[16].mxu0 %vm269_vm1, %v5522_v37 }
  0xae   : > { %4809 = vmatmul.mubr.msk.f32.vlgmr.msra.gmra.mrb[16].mxu1 %vm269_vm1, %v5656_v6  ;;  %4885 = vmatpush3.msk.msra.mxu0 %vm415_vm0, %v4141_v29 }
  0xaf   : > { %4833 = vmatpush3.msk.msra.mxu1 %vm415_vm0, %v4142_v28  ;;  %4811 = vmatprep.mubr.msk.f32.mxu1 %vm269_vm1, %v5662_v7 }
  0xb0   : > { %4863 = vmatprep.mubr.msk.f32.mxu0 %vm269_vm1, %v5530_v39  ;;  %4910 = vmatprep.subr.msk.mxu1 %vm415_vm0, %v4195_v30 }
  0xb1   : > { %4962 = vmatprep.subr.msk.mxu0 %vm415_vm0, %v4231_v31  ;;  %4864 = vmatmul.mubr.msk.f32.gmra.mrb[18].mxu0 %vm269_vm1, %v5546_v41 }
  0xb2   : > { %4812 = vmatmul.mubr.msk.f32.gmra.mrb[18].mxu1 %vm269_vm1, %v5674_v8  ;;  %4866 = vmatprep.mubr.msk.f32.mxu0 %vm269_vm1, %v5550_v43 }
  0xb3   : > { %4814 = vmatprep.mubr.msk.f32.mxu1 %vm269_vm1, %v5676_v9 }
  0xb5   : > { %4867 = vmatmul.mubr.msk.f32.gmra.mrb[20].mxu0 %vm269_vm1, %v5562_v45 }
  0xb6   : > { %4815 = vmatmul.mubr.msk.f32.gmra.mrb[20].mxu1 %vm269_vm1, %v5686_v10  ;;  %4869 = vmatprep.mubr.msk.f32.mxu0 %vm269_vm1, %v5566_v47 }
  0xb7   : > { %4817 = vmatprep.mubr.msk.f32.mxu1 %vm269_vm1, %v5688_v11 }
  0xb9   : > { %4870 = vmatmul.mubr.msk.f32.gmra.mrb[22].mxu0 %vm269_vm1, %v5584_v52 }
  0xba   : > { %4818 = vmatmul.mubr.msk.f32.gmra.mrb[22].mxu1 %vm269_vm1, %v5698_v12  ;;  %4872 = vmatprep.mubr.msk.f32.mxu0 %vm269_vm1, %v5588_v54 }
  0xbb   : > { %4820 = vmatprep.mubr.msk.f32.mxu1 %vm269_vm1, %v5700_v13 }
  0xbd   : > { %4873 = vmatmul.mubr.msk.f32.gmra.mrb[24].mxu0 %vm269_vm1, %v5600_v56 }
  0xbe   : > { %4821 = vmatmul.mubr.msk.f32.gmra.mrb[24].mxu1 %vm269_vm1, %v5710_v14  ;;  %4875 = vmatprep.mubr.msk.f32.mxu0 %vm269_vm1, %v5604_v58 }
  0xbf   : > { %4823 = vmatprep.mubr.msk.f32.mxu1 %vm269_vm1, %v5712_v15 }
  0xc1   : > { %4876 = vmatmul.mubr.msk.f32.gmra.mrb[26].mxu0 %vm269_vm1, %v5616_v60 }
  0xc2   : > { %4824 = vmatmul.mubr.msk.f32.gmra.mrb[26].mxu1 %vm269_vm1, %v5722_v16  ;;  %4878 = vmatprep.mubr.msk.f32.mxu0 %vm269_vm1, %v5620_v62 }
  0xc3   : > { %4826 = vmatprep.mubr.msk.f32.mxu1 %vm269_vm1, %v5724_v17 }
  0xc5   : > { %4879 = vmatmul.mubr.msk.f32.gmra.mrb[28].mxu0 %vm269_vm1, %v5632_v0 }
  0xc6   : > { %4827 = vmatmul.mubr.msk.f32.gmra.mrb[28].mxu1 %vm269_vm1, %v5734_v18  ;;  %4881 = vmatprep.mubr.msk.f32.mxu0 %vm269_vm1, %v5964_v34 }
  0xc7   : > { %4829 = vmatprep.mubr.msk.f32.mxu1 %vm269_vm1, %v5808_v24 }
  0xc9   : > { %4882 = vmatmul.mubr.msk.f32.gmra.mrb[30].mxu0 %vm269_vm1, %v5974_v35 }
  0xca   : > { %4830 = vmatmul.mubr.msk.f32.gmra.mrb[30].mxu1 %vm269_vm1, %v5820_v26  ;;  %4886 = vmatprep.mubr.msk.f32.mxu0 %vm269_vm1, %v5499_v32  ;;  %v2595_v32 = vld [vmem:[#allocation2 + $0xd8] sm:$0xff] }
  0xcb   : > { %4834 = vmatprep.mubr.msk.f32.mxu1 %vm269_vm1, %v5501_v33  ;;  %v2825_v33 = vld [vmem:[#allocation2 + $0xd9] sm:$0xff] }
  0xcd   : > { %4887 = vmatmul.mubr.msk.f32.vlgmr.msra.gmra.mrb[16].mxu0 %vm269_vm1, %v5520_v36  ;;  %v2596_v36 = vld [vmem:[#allocation2 + $0xe0] sm:$0xff] }
  0xce   : > { %4835 = vmatmul.mubr.msk.f32.vlgmr.msra.gmra.mrb[0].mxu1 %vm269_vm1, %v5522_v37  ;;  %4963 = vmatpush3.msk.msra.mxu0 %vm415_vm0, %v4231_v31  ;;  %v2826_v37 = vld [vmem:[#allocation2 + $0xe1] sm:$0xff] }
  0xcf   : > { %4911 = vmatpush3.msk.msra.mxu1 %vm415_vm0, %v4195_v30  ;;  %4837 = vmatprep.mubr.msk.f32.mxu1 %vm269_vm1, %v5530_v39 }
  0xd0   : > { %4889 = vmatprep.mubr.msk.f32.mxu0 %vm269_vm1, %v5528_v38  ;;  %4936 = vmatprep.subr.msk.mxu1 %vm415_vm0, %v4213_v48 }
  0xd1   : > { %4988 = vmatprep.subr.msk.mxu0 %vm415_vm0, %v4249_v49  ;;  %4890 = vmatmul.mubr.msk.f32.gmra.mrb[18].mxu0 %vm269_vm1, %v5544_v40 }
  0xd2   : > { %4838 = vmatmul.mubr.msk.f32.gmra.mrb[2].mxu1 %vm269_vm1, %v5546_v41  ;;  %4892 = vmatprep.mubr.msk.f32.mxu0 %vm269_vm1, %v5548_v42 }
  0xd3   : > { %4840 = vmatprep.mubr.msk.f32.mxu1 %vm269_vm1, %v5550_v43 }
  0xd5   : > { %4893 = vmatmul.mubr.msk.f32.gmra.mrb[20].mxu0 %vm269_vm1, %v5560_v44 }
  0xd6   : > { %4841 = vmatmul.mubr.msk.f32.gmra.mrb[4].mxu1 %vm269_vm1, %v5562_v45  ;;  %4895 = vmatprep.mubr.msk.f32.mxu0 %vm269_vm1, %v5564_v46 }
  0xd7   : > { %4843 = vmatprep.mubr.msk.f32.mxu1 %vm269_vm1, %v5566_v47 }
  0xd9   : > { %4896 = vmatmul.mubr.msk.f32.gmra.mrb[22].mxu0 %vm269_vm1, %v5582_v51 }
  0xda   : > { %4844 = vmatmul.mubr.msk.f32.gmra.mrb[6].mxu1 %vm269_vm1, %v5584_v52  ;;  %4898 = vmatprep.mubr.msk.f32.mxu0 %vm269_vm1, %v5586_v53 }
  0xdb   : > { %4846 = vmatprep.mubr.msk.f32.mxu1 %vm269_vm1, %v5588_v54 }
  0xdd   : > { %4899 = vmatmul.mubr.msk.f32.gmra.mrb[24].mxu0 %vm269_vm1, %v5598_v55 }
  0xde   : > { %4847 = vmatmul.mubr.msk.f32.gmra.mrb[8].mxu1 %vm269_vm1, %v5600_v56  ;;  %4901 = vmatprep.mubr.msk.f32.mxu0 %vm269_vm1, %v5602_v57 }
  0xdf   : > { %4849 = vmatprep.mubr.msk.f32.mxu1 %vm269_vm1, %v5604_v58 }
  0xe1   : > { %4902 = vmatmul.mubr.msk.f32.gmra.mrb[26].mxu0 %vm269_vm1, %v5614_v59 }
  0xe2   : > { %4850 = vmatmul.mubr.msk.f32.gmra.mrb[10].mxu1 %vm269_vm1, %v5616_v60  ;;  %4904 = vmatprep.mubr.msk.f32.mxu0 %vm269_vm1, %v5618_v61 }
  0xe3   : > { %4852 = vmatprep.mubr.msk.f32.mxu1 %vm269_vm1, %v5620_v62 }
  0xe5   : > { %4905 = vmatmul.mubr.msk.f32.gmra.mrb[28].mxu0 %vm269_vm1, %v5630_v63 }
  0xe6   : > { %4853 = vmatmul.mubr.msk.f32.gmra.mrb[12].mxu1 %vm269_vm1, %v5632_v0  ;;  %4907 = vmatprep.mubr.msk.f32.mxu0 %vm269_vm1, %v5810_v25 }
  0xe7   : > { %4855 = vmatprep.mubr.msk.f32.mxu1 %vm269_vm1, %v5964_v34 }
  0xe9   : > { %4908 = vmatmul.mubr.msk.f32.gmra.mrb[30].mxu0 %vm269_vm1, %v5822_v27 }
  0xea   : > { %4856 = vmatmul.mubr.msk.f32.gmra.mrb[14].mxu1 %vm269_vm1, %v5974_v35  ;;  %4964 = vmatprep.mubr.msk.f32.mxu0 %vm269_vm1, %v5528_v38 }
  0xeb   : > { %4912 = vmatprep.mubr.msk.f32.mxu1 %vm269_vm1, %v5662_v7 }
  0xed   : > { %4965 = vmatmul.mubr.msk.f32.vlgmr.msra.gmra.mrb[16].mxu0 %vm269_vm1, %v5544_v40 }
  0xee   : > { %4913 = vmatmul.mubr.msk.f32.vlgmr.msra.gmra.mrb[16].mxu1 %vm269_vm1, %v5674_v8  ;;  %4989 = vmatpush3.msk.msra.mxu0 %vm415_vm0, %v4249_v49 }
  0xef   : > { %4937 = vmatpush3.msk.msra.mxu1 %vm415_vm0, %v4213_v48  ;;  %4915 = vmatprep.mubr.msk.f32.mxu1 %vm269_vm1, %v5676_v9 }
  0xf0   : > { %4967 = vmatprep.mubr.msk.f32.mxu0 %vm269_vm1, %v5548_v42 }
  0xf1   : > { %4968 = vmatmul.mubr.msk.f32.gmra.mrb[18].mxu0 %vm269_vm1, %v5560_v44 }
  0xf2   : > { %4916 = vmatmul.mubr.msk.f32.gmra.mrb[18].mxu1 %vm269_vm1, %v5686_v10  ;;  %4970 = vmatprep.mubr.msk.f32.mxu0 %vm269_vm1, %v5564_v46 }
  0xf3   : > { %4918 = vmatprep.mubr.msk.f32.mxu1 %vm269_vm1, %v5688_v11 }
  0xf5   : > { %4971 = vmatmul.mubr.msk.f32.gmra.mrb[20].mxu0 %vm269_vm1, %v5582_v51 }
  0xf6   : > { %4919 = vmatmul.mubr.msk.f32.gmra.mrb[20].mxu1 %vm269_vm1, %v5698_v12  ;;  %4973 = vmatprep.mubr.msk.f32.mxu0 %vm269_vm1, %v5586_v53 }
  0xf7   : > { %4921 = vmatprep.mubr.msk.f32.mxu1 %vm269_vm1, %v5700_v13 }
  0xf9   : > { %4974 = vmatmul.mubr.msk.f32.gmra.mrb[22].mxu0 %vm269_vm1, %v5598_v55 }
  0xfa   : > { %4922 = vmatmul.mubr.msk.f32.gmra.mrb[22].mxu1 %vm269_vm1, %v5710_v14  ;;  %4976 = vmatprep.mubr.msk.f32.mxu0 %vm269_vm1, %v5602_v57 }
  0xfb   : > { %4924 = vmatprep.mubr.msk.f32.mxu1 %vm269_vm1, %v5712_v15 }
  0xfd   : > { %4977 = vmatmul.mubr.msk.f32.gmra.mrb[24].mxu0 %vm269_vm1, %v5614_v59 }
  0xfe   : > { %4925 = vmatmul.mubr.msk.f32.gmra.mrb[24].mxu1 %vm269_vm1, %v5722_v16  ;;  %4979 = vmatprep.mubr.msk.f32.mxu0 %vm269_vm1, %v5618_v61 }
  0xff   : > { %4927 = vmatprep.mubr.msk.f32.mxu1 %vm269_vm1, %v5724_v17 }
 0x101   : > { %4980 = vmatmul.mubr.msk.f32.gmra.mrb[26].mxu0 %vm269_vm1, %v5630_v63 }
 0x102   : > { %4928 = vmatmul.mubr.msk.f32.gmra.mrb[26].mxu1 %vm269_vm1, %v5734_v18  ;;  %4982 = vmatprep.mubr.msk.f32.mxu0 %vm269_vm1, %v5810_v25 }
 0x103   : > { %4930 = vmatprep.mubr.msk.f32.mxu1 %vm269_vm1, %v5808_v24 }
 0x105   : > { %4983 = vmatmul.mubr.msk.f32.gmra.mrb[28].mxu0 %vm269_vm1, %v5822_v27 }
 0x106   : > { %4931 = vmatmul.mubr.msk.f32.gmra.mrb[28].mxu1 %vm269_vm1, %v5820_v26  ;;  %4985 = vmatprep.mubr.msk.f32.mxu0 %vm269_vm1, %v2825_v33 }
 0x107   : > { %4933 = vmatprep.mubr.msk.f32.mxu1 %vm269_vm1, %v2595_v32 }
 0x109   : > { %4986 = vmatmul.mubr.msk.f32.gmra.mrb[30].mxu0 %vm269_vm1, %v2826_v37 }
 0x10a   : > { %4934 = vmatmul.mubr.msk.f32.gmra.mrb[30].mxu1 %vm269_vm1, %v2596_v36  ;;  %4990 = vmatprep.mubr.msk.f32.mxu0 %vm269_vm1, %v5530_v39  ;;  %v3222_v39 = vld [vmem:[#allocation2 + $0xe2] sm:$0xff] }
 0x10b   : > { %4938 = vmatprep.mubr.msk.f32.mxu1 %vm269_vm1, %v5528_v38  ;;  %v3221_v38 = vld [vmem:[#allocation2 + $0xda] sm:$0xff] }
 0x10d   : > { %4991 = vmatmul.mubr.msk.f32.vlgmr.msra.gmra.mrb[16].mxu0 %vm269_vm1, %v5546_v41 }
 0x10e   : > { %4939 = vmatmul.mubr.msk.f32.vlgmr.msra.gmra.mrb[16].mxu1 %vm269_vm1, %v5544_v40  ;;  %4993 = vmatprep.mubr.msk.f32.mxu0 %vm269_vm1, %v5550_v43  ;;  %v6180_v40 = vld [vmem:[%s6537_s3] ss:$0 sm:$0xff] }
 0x10f   : > { %4941 = vmatprep.mubr.msk.f32.mxu1 %vm269_vm1, %v5548_v42 }
 0x111   : > { %4994 = vmatmul.mubr.msk.f32.gmra.mrb[18].mxu0 %vm269_vm1, %v5562_v45 }
 0x112   : > { %4942 = vmatmul.mubr.msk.f32.gmra.mrb[18].mxu1 %vm269_vm1, %v5560_v44  ;;  %4996 = vmatprep.mubr.msk.f32.mxu0 %vm269_vm1, %v5566_v47 }
 0x113   : > { %4944 = vmatprep.mubr.msk.f32.mxu1 %vm269_vm1, %v5564_v46 }
 0x115   : > { %4997 = vmatmul.mubr.msk.f32.gmra.mrb[20].mxu0 %vm269_vm1, %v5584_v52 }
 0x116   : > { %4945 = vmatmul.mubr.msk.f32.gmra.mrb[20].mxu1 %vm269_vm1, %v5582_v51  ;;  %4999 = vmatprep.mubr.msk.f32.mxu0 %vm269_vm1, %v5588_v54 }
 0x117   : > { %4947 = vmatprep.mubr.msk.f32.mxu1 %vm269_vm1, %v5586_v53 }
 0x119   : > { %5000 = vmatmul.mubr.msk.f32.gmra.mrb[22].mxu0 %vm269_vm1, %v5600_v56 }
 0x11a   : > { %4948 = vmatmul.mubr.msk.f32.gmra.mrb[22].mxu1 %vm269_vm1, %v5598_v55  ;;  %5002 = vmatprep.mubr.msk.f32.mxu0 %vm269_vm1, %v5604_v58 }
 0x11b   : > { %4950 = vmatprep.mubr.msk.f32.mxu1 %vm269_vm1, %v5602_v57 }
 0x11d   : > { %5003 = vmatmul.mubr.msk.f32.gmra.mrb[24].mxu0 %vm269_vm1, %v5616_v60 }
 0x11e   : > { %4951 = vmatmul.mubr.msk.f32.gmra.mrb[24].mxu1 %vm269_vm1, %v5614_v59  ;;  %5005 = vmatprep.mubr.msk.f32.mxu0 %vm269_vm1, %v5620_v62 }
 0x11f   : > { %4953 = vmatprep.mubr.msk.f32.mxu1 %vm269_vm1, %v5618_v61 }
 0x121   : > { %5006 = vmatmul.mubr.msk.f32.gmra.mrb[26].mxu0 %vm269_vm1, %v5632_v0 }
 0x122   : > { %4954 = vmatmul.mubr.msk.f32.gmra.mrb[26].mxu1 %vm269_vm1, %v5630_v63  ;;  %5008 = vmatprep.mubr.msk.f32.mxu0 %vm269_vm1, %v5964_v34 }
 0x123   : > { %4956 = vmatprep.mubr.msk.f32.mxu1 %vm269_vm1, %v5810_v25 }
 0x125   : > { %5009 = vmatmul.mubr.msk.f32.gmra.mrb[28].mxu0 %vm269_vm1, %v5974_v35 }
 0x126   : > { %4957 = vmatmul.mubr.msk.f32.gmra.mrb[28].mxu1 %vm269_vm1, %v5822_v27  ;;  %5011 = vmatprep.mubr.msk.f32.mxu0 %vm269_vm1, %v3221_v38 }
 0x127   : > { %4959 = vmatprep.mubr.msk.f32.mxu1 %vm269_vm1, %v2825_v33 }
 0x129   : > { %5012 = vmatmul.mubr.msk.f32.gmra.mrb[30].mxu0 %vm269_vm1, %v3222_v39 }
 0x12a   : > { %4960 = vmatmul.mubr.msk.f32.gmra.mrb[30].mxu1 %vm269_vm1, %v2826_v37 }
 0x160   : > { %v4732_v41 = vpop.f32.mrb[0].mxu0 }
 0x161   : > { %v3444_v42 = vadd.f32 %v4732_v41, %v6180_v40  ;;  %v1491_v43 = vpop.f32.mrb[1].mxu0 }
 0x162   : > { %v3443_v44 = vadd.f32 %v6180_v40, %v1491_v43 }
 0x163   : > { %3460 = vst.msk [vmem:[%s6184_s13 + $0x8] sm:$0xff] %vm269_vm1, %v3444_v42 }
 0x164   : > { %3459 = vst.msk [vmem:[%s6184_s13] sm:$0xff] %vm269_vm1, %v3443_v44  ;;  %v4735_v45 = vpop.f32.mrb[2].mxu0 }
 0x165   : > { %v3446_v46 = vadd.f32 %v4735_v45, %v6180_v40  ;;  %v1501_v47 = vpop.f32.mrb[3].mxu0 }
 0x166   : > { %v3445_v50 = vadd.f32 %v6180_v40, %v1501_v47 }
 0x167   : > { %3462 = vst.msk [vmem:[%s6184_s13 + $0x18] sm:$0xff] %vm269_vm1, %v3446_v46 }
 0x168   : > { %3461 = vst.msk [vmem:[%s6184_s13 + $0x10] sm:$0xff] %vm269_vm1, %v3445_v50  ;;  %v4738_v51 = vpop.f32.mrb[4].mxu0 }
 0x169   : > { %v3448_v52 = vadd.f32 %v4738_v51, %v6180_v40  ;;  %v1511_v53 = vpop.f32.mrb[5].mxu0 }
 0x16a   : > { %v3447_v54 = vadd.f32 %v6180_v40, %v1511_v53 }
 0x16b   : > { %3464 = vst.msk [vmem:[%s6184_s13 + $0x28] sm:$0xff] %vm269_vm1, %v3448_v52 }
 0x16c   : > { %3463 = vst.msk [vmem:[%s6184_s13 + $0x20] sm:$0xff] %vm269_vm1, %v3447_v54  ;;  %v4741_v55 = vpop.f32.mrb[6].mxu0 }
 0x16d   : > { %v3450_v56 = vadd.f32 %v4741_v55, %v6180_v40  ;;  %v1521_v57 = vpop.f32.mrb[7].mxu0 }
 0x16e   : > { %v3449_v58 = vadd.f32 %v6180_v40, %v1521_v57 }
 0x16f   : > { %3466 = vst.msk [vmem:[%s6184_s13 + $0x38] sm:$0xff] %vm269_vm1, %v3450_v56 }
 0x170   : > { %3465 = vst.msk [vmem:[%s6184_s13 + $0x30] sm:$0xff] %vm269_vm1, %v3449_v58  ;;  %v4744_v59 = vpop.f32.mrb[8].mxu0 }
 0x171   : > { %v3452_v60 = vadd.f32 %v4744_v59, %v6180_v40  ;;  %v1531_v61 = vpop.f32.mrb[9].mxu0 }
 0x172   : > { %v3451_v62 = vadd.f32 %v6180_v40, %v1531_v61 }
 0x173   : > { %3468 = vst.msk [vmem:[%s6184_s13 + $0x48] sm:$0xff] %vm269_vm1, %v3452_v60 }
 0x174   : > { %3467 = vst.msk [vmem:[%s6184_s13 + $0x40] sm:$0xff] %vm269_vm1, %v3451_v62  ;;  %v4747_v63 = vpop.f32.mrb[10].mxu0 }
 0x175   : > { %v3454_v0 = vadd.f32 %v4747_v63, %v6180_v40  ;;  %v1541_v1 = vpop.f32.mrb[11].mxu0 }
 0x176   : > { %v3453_v2 = vadd.f32 %v6180_v40, %v1541_v1 }
 0x177   : > { %3470 = vst.msk [vmem:[%s6184_s13 + $0x58] sm:$0xff] %vm269_vm1, %v3454_v0 }
 0x178   : > { %3469 = vst.msk [vmem:[%s6184_s13 + $0x50] sm:$0xff] %vm269_vm1, %v3453_v2  ;;  %v4750_v3 = vpop.f32.mrb[12].mxu0 }
 0x179   : > { %v3456_v4 = vadd.f32 %v4750_v3, %v6180_v40  ;;  %v1551_v5 = vpop.f32.mrb[13].mxu0 }
 0x17a   : > { %v3455_v6 = vadd.f32 %v6180_v40, %v1551_v5 }
 0x17b   : > { %3472 = vst.msk [vmem:[%s6184_s13 + $0x68] sm:$0xff] %vm269_vm1, %v3456_v4 }
 0x17c   : > { %3471 = vst.msk [vmem:[%s6184_s13 + $0x60] sm:$0xff] %vm269_vm1, %v3455_v6  ;;  %v4753_v7 = vpop.f32.mrb[14].mxu0 }
 0x17d   : > { %v3458_v8 = vadd.f32 %v4753_v7, %v6180_v40  ;;  %v1561_v9 = vpop.f32.mrb[15].mxu0 }
 0x17e   : > { %v3457_v10 = vadd.f32 %v6180_v40, %v1561_v9 }
 0x17f   : > { %3474 = vst.msk [vmem:[%s6184_s13 + $0x78] sm:$0xff] %vm269_vm1, %v3458_v8 }
 0x180   : > { %3473 = vst.msk [vmem:[%s6184_s13 + $0x70] sm:$0xff] %vm269_vm1, %v3457_v10 }
 0x1a1   : > { %v4836_v11 = vpop.f32.mrb[0].mxu1 }
 0x1a2   : > { %v3476_v12 = vadd.f32 %v4836_v11, %v6180_v40  ;;  %v2187_v13 = vpop.f32.mrb[1].mxu1 }
 0x1a3   : > { %v3475_v14 = vadd.f32 %v6180_v40, %v2187_v13 }
 0x1a4   : > { %4269 = vst.msk [vmem:[%s6184_s13 + $0x88] sm:$0xff] %vm269_vm1, %v3476_v12 }
 0x1a5   : > { %4268 = vst.msk [vmem:[%s6184_s13 + $0x80] sm:$0xff] %vm269_vm1, %v3475_v14  ;;  %v4839_v15 = vpop.f32.mrb[2].mxu1 }
 0x1a6   : > { %v3478_v16 = vadd.f32 %v4839_v15, %v6180_v40  ;;  %v2197_v17 = vpop.f32.mrb[3].mxu1 }
 0x1a7   : > { %v3477_v18 = vadd.f32 %v6180_v40, %v2197_v17 }
 0x1a8   : > { %4271 = vst.msk [vmem:[%s6184_s13 + $0x98] sm:$0xff] %vm269_vm1, %v3478_v16 }
 0x1a9   : > { %4270 = vst.msk [vmem:[%s6184_s13 + $0x90] sm:$0xff] %vm269_vm1, %v3477_v18  ;;  %v4842_v19 = vpop.f32.mrb[4].mxu1 }
 0x1aa   : > { %v3480_v20 = vadd.f32 %v4842_v19, %v6180_v40  ;;  %v2207_v21 = vpop.f32.mrb[5].mxu1 }
 0x1ab   : > { %v3479_v22 = vadd.f32 %v6180_v40, %v2207_v21 }
 0x1ac   : > { %4273 = vst.msk [vmem:[%s6184_s13 + $0xa8] sm:$0xff] %vm269_vm1, %v3480_v20 }
 0x1ad   : > { %4272 = vst.msk [vmem:[%s6184_s13 + $0xa0] sm:$0xff] %vm269_vm1, %v3479_v22  ;;  %v4845_v23 = vpop.f32.mrb[6].mxu1 }
 0x1ae   : > { %v3482_v24 = vadd.f32 %v4845_v23, %v6180_v40  ;;  %v2217_v25 = vpop.f32.mrb[7].mxu1 }
 0x1af   : > { %v3481_v26 = vadd.f32 %v6180_v40, %v2217_v25 }
 0x1b0   : > { %4275 = vst.msk [vmem:[%s6184_s13 + $0xb8] sm:$0xff] %vm269_vm1, %v3482_v24 }
 0x1b1   : > { %4274 = vst.msk [vmem:[%s6184_s13 + $0xb0] sm:$0xff] %vm269_vm1, %v3481_v26  ;;  %v4848_v27 = vpop.f32.mrb[8].mxu1 }
 0x1b2   : > { %v3484_v28 = vadd.f32 %v4848_v27, %v6180_v40  ;;  %v2227_v29 = vpop.f32.mrb[9].mxu1 }
 0x1b3   : > { %v3483_v30 = vadd.f32 %v6180_v40, %v2227_v29 }
 0x1b4   : > { %4277 = vst.msk [vmem:[%s6184_s13 + $0xc8] sm:$0xff] %vm269_vm1, %v3484_v28 }
 0x1b5   : > { %4276 = vst.msk [vmem:[%s6184_s13 + $0xc0] sm:$0xff] %vm269_vm1, %v3483_v30  ;;  %v4851_v31 = vpop.f32.mrb[10].mxu1 }
 0x1b6   : > { %v3486_v34 = vadd.f32 %v4851_v31, %v6180_v40  ;;  %v2237_v35 = vpop.f32.mrb[11].mxu1 }
 0x1b7   : > { %v3485_v48 = vadd.f32 %v6180_v40, %v2237_v35 }
 0x1b8   : > { %4279 = vst.msk [vmem:[%s6184_s13 + $0xd8] sm:$0xff] %vm269_vm1, %v3486_v34 }
 0x1b9   : > { %4278 = vst.msk [vmem:[%s6184_s13 + $0xd0] sm:$0xff] %vm269_vm1, %v3485_v48  ;;  %v4854_v49 = vpop.f32.mrb[12].mxu1 }
 0x1ba   : > { %v3488_v32 = vadd.f32 %v4854_v49, %v6180_v40  ;;  %v2247_v33 = vpop.f32.mrb[13].mxu1 }
 0x1bb   : > { %v3487_v36 = vadd.f32 %v6180_v40, %v2247_v33 }
 0x1bc   : > { %4281 = vst.msk [vmem:[%s6184_s13 + $0xe8] sm:$0xff] %vm269_vm1, %v3488_v32 }
 0x1bd   : > { %4280 = vst.msk [vmem:[%s6184_s13 + $0xe0] sm:$0xff] %vm269_vm1, %v3487_v36  ;;  %v4857_v37 = vpop.f32.mrb[14].mxu1 }
 0x1be   : > { %v3490_v38 = vadd.f32 %v4857_v37, %v6180_v40  ;;  %v2257_v39 = vpop.f32.mrb[15].mxu1 }
 0x1bf   : > { %v3489_v41 = vadd.f32 %v6180_v40, %v2257_v39 }
 0x1c0   : > { %4283 = vst.msk [vmem:[%s6184_s13 + $0xf8] sm:$0xff] %vm269_vm1, %v3490_v38 }
 0x1c1   : > { %4282 = vst.msk [vmem:[%s6184_s13 + $0xf0] sm:$0xff] %vm269_vm1, %v3489_v41 }
 0x1e0   : > { %v4992_v43 = vpop.f32.mrb[16].mxu0 }
 0x1e1   : > { %v4940_v42 = vpop.f32.mrb[16].mxu1  ;;  %v3542_v45 = vadd.f32 %v4992_v43, %v6180_v40  ;;  %v3342_v47 = vpop.f32.mrb[17].mxu0  ;;  %v3743_v43 = vld [vmem:[%s6184_s13 + $0x8] sm:$0xff] (%p5393_p5) }
 0x1e2   : > { %v3509_v44 = vadd.f32 %v4940_v42, %v6180_v40  ;;  %v2946_v46 = vpop.f32.mrb[17].mxu1  ;;  %v3541_v51 = vadd.f32 %v6180_v40, %v3342_v47  ;;  %v3751_v47 = vld [vmem:[%s6184_s13 + $0x28] sm:$0xff] (%p5393_p5)  ;;  %3744 = vst [vmem:[%s6392_s28 + $0x8] sm:$0xff] (%p5393_p5), %v3743_v43 }
 0x1e3   : > { %v3508_v50 = vadd.f32 %v6180_v40, %v2946_v46  ;;  %4301 = vst.msk [vmem:[%s6184_s13 + $0x188] sm:$0xff] %vm269_vm1, %v3542_v45  ;;  %v3747_v45 = vld [vmem:[%s6184_s13 + $0x18] sm:$0xff] (%p5393_p5)  ;;  %v3749_v46 = vld [vmem:[%s6184_s13 + $0x20] sm:$0xff] (%p5393_p5)  ;;  %3752 = vst [vmem:[%s6392_s28 + $0x28] sm:$0xff] (%p5393_p5), %v3751_v47 }
 0x1e4   : > { %4285 = vst.msk [vmem:[%s6184_s13 + $0x108] sm:$0xff] %vm269_vm1, %v3509_v44  ;;  %4300 = vst.msk [vmem:[%s6184_s13 + $0x180] sm:$0xff] %vm269_vm1, %v3541_v51  ;;  %v4995_v53 = vpop.f32.mrb[18].mxu0  ;;  %v3745_v44 = vld [vmem:[%s6184_s13 + $0x10] sm:$0xff] (%p5393_p5)  ;;  %v3755_v51 = vld [vmem:[%s6184_s13 + $0x38] sm:$0xff] (%p5393_p5) }
 0x1e5   : > { %4284 = vst.msk [vmem:[%s6184_s13 + $0x100] sm:$0xff] %vm269_vm1, %v3508_v50  ;;  %v4943_v52 = vpop.f32.mrb[18].mxu1  ;;  %v3544_v55 = vadd.f32 %v4995_v53, %v6180_v40  ;;  %v3352_v57 = vpop.f32.mrb[19].mxu0  ;;  %v3753_v50 = vld [vmem:[%s6184_s13 + $0x30] sm:$0xff] (%p5393_p5)  ;;  %v3759_v53 = vld [vmem:[%s6184_s13 + $0x48] sm:$0xff] (%p5393_p5)  ;;  %3746 = vst [vmem:[%s6392_s28 + $0x10] sm:$0xff] (%p5393_p5), %v3745_v44 }
 0x1e6   : > { %v3511_v54 = vadd.f32 %v4943_v52, %v6180_v40  ;;  %v2956_v56 = vpop.f32.mrb[19].mxu1  ;;  %v3543_v59 = vadd.f32 %v6180_v40, %v3352_v57  ;;  %v3757_v52 = vld [vmem:[%s6184_s13 + $0x40] sm:$0xff] (%p5393_p5)  ;;  %3748 = vst [vmem:[%s6392_s28 + $0x18] sm:$0xff] (%p5393_p5), %v3747_v45  ;;  %3750 = vst [vmem:[%s6392_s28 + $0x20] sm:$0xff] (%p5393_p5), %v3749_v46  ;;  %v3767_v57 = vld [vmem:[%s6184_s13 + $0x68] sm:$0xff] (%p5393_p5) }
 0x1e7   : > { %v3510_v58 = vadd.f32 %v6180_v40, %v2956_v56  ;;  %4303 = vst.msk [vmem:[%s6184_s13 + $0x198] sm:$0xff] %vm269_vm1, %v3544_v55  ;;  %v3763_v55 = vld [vmem:[%s6184_s13 + $0x58] sm:$0xff] (%p5393_p5)  ;;  %3754 = vst [vmem:[%s6392_s28 + $0x30] sm:$0xff] (%p5393_p5), %v3753_v50  ;;  %v3765_v56 = vld [vmem:[%s6184_s13 + $0x60] sm:$0xff] (%p5393_p5) }
 0x1e8   : > { %4287 = vst.msk [vmem:[%s6184_s13 + $0x118] sm:$0xff] %vm269_vm1, %v3511_v54  ;;  %4302 = vst.msk [vmem:[%s6184_s13 + $0x190] sm:$0xff] %vm269_vm1, %v3543_v59  ;;  %v4998_v61 = vpop.f32.mrb[20].mxu0  ;;  %v3761_v54 = vld [vmem:[%s6184_s13 + $0x50] sm:$0xff] (%p5393_p5)  ;;  %v3771_v59 = vld [vmem:[%s6184_s13 + $0x78] sm:$0xff] (%p5393_p5) }
 0x1e9   : > { %4286 = vst.msk [vmem:[%s6184_s13 + $0x110] sm:$0xff] %vm269_vm1, %v3510_v58  ;;  %v4946_v60 = vpop.f32.mrb[20].mxu1  ;;  %v3546_v63 = vadd.f32 %v4998_v61, %v6180_v40  ;;  %v3362_v1 = vpop.f32.mrb[21].mxu0  ;;  %3756 = vst [vmem:[%s6392_s28 + $0x38] sm:$0xff] (%p5393_p5), %v3755_v51  ;;  %v3769_v58 = vld [vmem:[%s6184_s13 + $0x70] sm:$0xff] (%p5393_p5)  ;;  %v3775_v61 = vld [vmem:[%s6184_s13 + $0x88] sm:$0xff] (%p5393_p5) }
 0x1ea   : > { %v3513_v62 = vadd.f32 %v4946_v60, %v6180_v40  ;;  %v2966_v0 = vpop.f32.mrb[21].mxu1  ;;  %v3545_v3 = vadd.f32 %v6180_v40, %v3362_v1  ;;  %3758 = vst [vmem:[%s6392_s28 + $0x40] sm:$0xff] (%p5393_p5), %v3757_v52  ;;  %3760 = vst [vmem:[%s6392_s28 + $0x48] sm:$0xff] (%p5393_p5), %v3759_v53  ;;  %v3773_v60 = vld [vmem:[%s6184_s13 + $0x80] sm:$0xff] (%p5393_p5)  ;;  %v3783_v1 = vld [vmem:[%s6184_s13 + $0xa8] sm:$0xff] (%p5393_p5) }
 0x1eb   : > { %v3512_v2 = vadd.f32 %v6180_v40, %v2966_v0  ;;  %4305 = vst.msk [vmem:[%s6184_s13 + $0x1a8] sm:$0xff] %vm269_vm1, %v3546_v63  ;;  %3762 = vst [vmem:[%s6392_s28 + $0x50] sm:$0xff] (%p5393_p5), %v3761_v54  ;;  %v3779_v63 = vld [vmem:[%s6184_s13 + $0x98] sm:$0xff] (%p5393_p5)  ;;  %v3781_v0 = vld [vmem:[%s6184_s13 + $0xa0] sm:$0xff] (%p5393_p5) }
 0x1ec   : > { %4289 = vst.msk [vmem:[%s6184_s13 + $0x128] sm:$0xff] %vm269_vm1, %v3513_v62  ;;  %4304 = vst.msk [vmem:[%s6184_s13 + $0x1a0] sm:$0xff] %vm269_vm1, %v3545_v3  ;;  %v5001_v5 = vpop.f32.mrb[22].mxu0  ;;  %v3777_v62 = vld [vmem:[%s6184_s13 + $0x90] sm:$0xff] (%p5393_p5)  ;;  %v3787_v3 = vld [vmem:[%s6184_s13 + $0xb8] sm:$0xff] (%p5393_p5) }
 0x1ed   : > { %4288 = vst.msk [vmem:[%s6184_s13 + $0x120] sm:$0xff] %vm269_vm1, %v3512_v2  ;;  %v4949_v4 = vpop.f32.mrb[22].mxu1  ;;  %v3548_v7 = vadd.f32 %v5001_v5, %v6180_v40  ;;  %v3372_v9 = vpop.f32.mrb[23].mxu0  ;;  %3764 = vst [vmem:[%s6392_s28 + $0x58] sm:$0xff] (%p5393_p5), %v3763_v55  ;;  %v3785_v2 = vld [vmem:[%s6184_s13 + $0xb0] sm:$0xff] (%p5393_p5)  ;;  %v3791_v5 = vld [vmem:[%s6184_s13 + $0xc8] sm:$0xff] (%p5393_p5) }
 0x1ee   : > { %v3515_v6 = vadd.f32 %v4949_v4, %v6180_v40  ;;  %v2976_v8 = vpop.f32.mrb[23].mxu1  ;;  %v3547_v11 = vadd.f32 %v6180_v40, %v3372_v9  ;;  %3766 = vst [vmem:[%s6392_s28 + $0x60] sm:$0xff] (%p5393_p5), %v3765_v56  ;;  %3768 = vst [vmem:[%s6392_s28 + $0x68] sm:$0xff] (%p5393_p5), %v3767_v57  ;;  %v3789_v4 = vld [vmem:[%s6184_s13 + $0xc0] sm:$0xff] (%p5393_p5)  ;;  %v3799_v9 = vld [vmem:[%s6184_s13 + $0xe8] sm:$0xff] (%p5393_p5) }
 0x1ef   : > { %v3514_v10 = vadd.f32 %v6180_v40, %v2976_v8  ;;  %4307 = vst.msk [vmem:[%s6184_s13 + $0x1b8] sm:$0xff] %vm269_vm1, %v3548_v7  ;;  %3770 = vst [vmem:[%s6392_s28 + $0x70] sm:$0xff] (%p5393_p5), %v3769_v58  ;;  %v3795_v7 = vld [vmem:[%s6184_s13 + $0xd8] sm:$0xff] (%p5393_p5)  ;;  %v3797_v8 = vld [vmem:[%s6184_s13 + $0xe0] sm:$0xff] (%p5393_p5) }
 0x1f0   : > { %4291 = vst.msk [vmem:[%s6184_s13 + $0x138] sm:$0xff] %vm269_vm1, %v3515_v6  ;;  %4306 = vst.msk [vmem:[%s6184_s13 + $0x1b0] sm:$0xff] %vm269_vm1, %v3547_v11  ;;  %v5004_v13 = vpop.f32.mrb[24].mxu0  ;;  %v3793_v6 = vld [vmem:[%s6184_s13 + $0xd0] sm:$0xff] (%p5393_p5)  ;;  %v3803_v11 = vld [vmem:[%s6184_s13 + $0xf8] sm:$0xff] (%p5393_p5) }
 0x1f1   : > { %4290 = vst.msk [vmem:[%s6184_s13 + $0x130] sm:$0xff] %vm269_vm1, %v3514_v10  ;;  %v4952_v12 = vpop.f32.mrb[24].mxu1  ;;  %v3550_v15 = vadd.f32 %v5004_v13, %v6180_v40  ;;  %v3382_v17 = vpop.f32.mrb[25].mxu0  ;;  %3772 = vst [vmem:[%s6392_s28 + $0x78] sm:$0xff] (%p5393_p5), %v3771_v59  ;;  %v3801_v10 = vld [vmem:[%s6184_s13 + $0xf0] sm:$0xff] (%p5393_p5)  ;;  %v3807_v13 = vld [vmem:[%s6184_s13 + $0x108] sm:$0xff] (%p5393_p5) }
 0x1f2   : > { %v3517_v14 = vadd.f32 %v4952_v12, %v6180_v40  ;;  %v2986_v16 = vpop.f32.mrb[25].mxu1  ;;  %v3549_v19 = vadd.f32 %v6180_v40, %v3382_v17  ;;  %3774 = vst [vmem:[%s6392_s28 + $0x100] sm:$0xff] (%p5393_p5), %v3773_v60  ;;  %3776 = vst [vmem:[%s6392_s28 + $0x108] sm:$0xff] (%p5393_p5), %v3775_v61  ;;  %v3805_v12 = vld [vmem:[%s6184_s13 + $0x100] sm:$0xff] (%p5393_p5) }
 0x1f3   : > { %v3516_v18 = vadd.f32 %v6180_v40, %v2986_v16  ;;  %4309 = vst.msk [vmem:[%s6184_s13 + $0x1c8] sm:$0xff] %vm269_vm1, %v3550_v15  ;;  %3778 = vst [vmem:[%s6392_s28 + $0x110] sm:$0xff] (%p5393_p5), %v3777_v62  ;;  %v3811_v15 = vld [vmem:[%s6184_s13 + $0x118] sm:$0xff] (%p5393_p5)  ;;  %v3815_v17 = vld [vmem:[%s6184_s13 + $0x128] sm:$0xff] (%p5393_p5) }
 0x1f4   : > { %4293 = vst.msk [vmem:[%s6184_s13 + $0x148] sm:$0xff] %vm269_vm1, %v3517_v14  ;;  %4308 = vst.msk [vmem:[%s6184_s13 + $0x1c0] sm:$0xff] %vm269_vm1, %v3549_v19  ;;  %v5007_v21 = vpop.f32.mrb[26].mxu0  ;;  %v3809_v14 = vld [vmem:[%s6184_s13 + $0x110] sm:$0xff] (%p5393_p5)  ;;  %v3813_v16 = vld [vmem:[%s6184_s13 + $0x120] sm:$0xff] (%p5393_p5) }
 0x1f5   : > { %4292 = vst.msk [vmem:[%s6184_s13 + $0x140] sm:$0xff] %vm269_vm1, %v3516_v18  ;;  %v4955_v20 = vpop.f32.mrb[26].mxu1  ;;  %v3552_v23 = vadd.f32 %v5007_v21, %v6180_v40  ;;  %v3392_v25 = vpop.f32.mrb[27].mxu0  ;;  %3780 = vst [vmem:[%s6392_s28 + $0x118] sm:$0xff] (%p5393_p5), %v3779_v63 }
 0x1f6   : > { %v3519_v22 = vadd.f32 %v4955_v20, %v6180_v40  ;;  %v2996_v24 = vpop.f32.mrb[27].mxu1  ;;  %v3551_v27 = vadd.f32 %v6180_v40, %v3392_v25  ;;  %3782 = vst [vmem:[%s6392_s28 + $0x120] sm:$0xff] (%p5393_p5), %v3781_v0  ;;  %3784 = vst [vmem:[%s6392_s28 + $0x128] sm:$0xff] (%p5393_p5), %v3783_v1 }
 0x1f7   : > { %v3518_v26 = vadd.f32 %v6180_v40, %v2996_v24  ;;  %4311 = vst.msk [vmem:[%s6184_s13 + $0x1d8] sm:$0xff] %vm269_vm1, %v3552_v23  ;;  %3786 = vst [vmem:[%s6392_s28 + $0x130] sm:$0xff] (%p5393_p5), %v3785_v2  ;;  %v3819_v19 = vld [vmem:[%s6184_s13 + $0x138] sm:$0xff] (%p5393_p5) }
 0x1f8   : > { %4295 = vst.msk [vmem:[%s6184_s13 + $0x158] sm:$0xff] %vm269_vm1, %v3519_v22  ;;  %4310 = vst.msk [vmem:[%s6184_s13 + $0x1d0] sm:$0xff] %vm269_vm1, %v3551_v27  ;;  %v5010_v29 = vpop.f32.mrb[28].mxu0  ;;  %v3817_v18 = vld [vmem:[%s6184_s13 + $0x130] sm:$0xff] (%p5393_p5) }
 0x1f9   : > { %4294 = vst.msk [vmem:[%s6184_s13 + $0x150] sm:$0xff] %vm269_vm1, %v3518_v26  ;;  %v4958_v28 = vpop.f32.mrb[28].mxu1  ;;  %v3554_v31 = vadd.f32 %v5010_v29, %v6180_v40  ;;  %v3402_v35 = vpop.f32.mrb[29].mxu0  ;;  %3788 = vst [vmem:[%s6392_s28 + $0x138] sm:$0xff] (%p5393_p5), %v3787_v3  ;;  %v3839_v29 = vld [vmem:[%s6184_s13 + $0x188] sm:$0xff] (%p5393_p5) }
 0x1fa   : > { %v3521_v30 = vadd.f32 %v4958_v28, %v6180_v40  ;;  %v3006_v34 = vpop.f32.mrb[29].mxu1  ;;  %v3553_v49 = vadd.f32 %v6180_v40, %v3402_v35  ;;  %3790 = vst [vmem:[%s6392_s28 + $0x140] sm:$0xff] (%p5393_p5), %v3789_v4  ;;  %3792 = vst [vmem:[%s6392_s28 + $0x148] sm:$0xff] (%p5393_p5), %v3791_v5  ;;  %v3837_v28 = vld [vmem:[%s6184_s13 + $0x180] sm:$0xff] (%p5393_p5)  ;;  %v3847_v35 = vld [vmem:[%s6184_s13 + $0x1a8] sm:$0xff] (%p5393_p5) }
 0x1fb   : > { %v3520_v48 = vadd.f32 %v6180_v40, %v3006_v34  ;;  %4313 = vst.msk [vmem:[%s6184_s13 + $0x1e8] sm:$0xff] %vm269_vm1, %v3554_v31  ;;  %3580 = sbr.rel (!%p5393_p5) target bundleno = 531 (0x213), region = 40  ;;  %3794 = vst [vmem:[%s6392_s28 + $0x150] sm:$0xff] (%p5393_p5), %v3793_v6  ;;  %v3823_v21 = vld [vmem:[%s6184_s13 + $0x148] sm:$0xff] (%p5393_p5)  ;;  %v3843_v31 = vld [vmem:[%s6184_s13 + $0x198] sm:$0xff] (%p5393_p5) }
 0x1fc   : > { %4297 = vst.msk [vmem:[%s6184_s13 + $0x168] sm:$0xff] %vm269_vm1, %v3521_v30  ;;  %4312 = vst.msk [vmem:[%s6184_s13 + $0x1e0] sm:$0xff] %vm269_vm1, %v3553_v49  ;;  %v5013_v33 = vpop.f32.mrb[30].mxu0  ;;  %v3821_v20 = vld [vmem:[%s6184_s13 + $0x140] sm:$0xff] (%p5393_p5)  ;;  %v3841_v30 = vld [vmem:[%s6184_s13 + $0x190] sm:$0xff] (%p5393_p5) }
 0x1fd   : > { %4296 = vst.msk [vmem:[%s6184_s13 + $0x160] sm:$0xff] %vm269_vm1, %v3520_v48  ;;  %v4961_v32 = vpop.f32.mrb[30].mxu1  ;;  %v3556_v37 = vadd.f32 %v5013_v33, %v6180_v40  ;;  %v3412_v39 = vpop.f32.mrb[31].mxu0  ;;  %3796 = vst [vmem:[%s6392_s28 + $0x158] sm:$0xff] (%p5393_p5), %v3795_v7  ;;  %v3845_v34 = vld [vmem:[%s6184_s13 + $0x1a0] sm:$0xff] (%p5393_p5)  ;;  %v3849_v48 = vld [vmem:[%s6184_s13 + $0x1b0] sm:$0xff] (%p5393_p5) }
 0x1fe   : > { %v3523_v36 = vadd.f32 %v4961_v32, %v6180_v40  ;;  %v3016_v38 = vpop.f32.mrb[31].mxu1  ;;  %v3555_v42 = vadd.f32 %v6180_v40, %v3412_v39  ;;  %3798 = vst [vmem:[%s6392_s28 + $0x160] sm:$0xff] (%p5393_p5), %v3797_v8  ;;  %3800 = vst [vmem:[%s6392_s28 + $0x168] sm:$0xff] (%p5393_p5), %v3799_v9  ;;  %v3851_v49 = vld [vmem:[%s6184_s13 + $0x1b8] sm:$0xff] (%p5393_p5)  ;;  %v3853_v32 = vld [vmem:[%s6184_s13 + $0x1c0] sm:$0xff] (%p5393_p5) }
 0x1ff   : > { %v3522_v41 = vadd.f32 %v6180_v40, %v3016_v38  ;;  %4315 = vst.msk [vmem:[%s6184_s13 + $0x1f8] sm:$0xff] %vm269_vm1, %v3556_v37  ;;  %v3741_v40 = vld [vmem:[%s6184_s13] sm:$0xff] (%p5393_p5)  ;;  %3802 = vst [vmem:[%s6392_s28 + $0x170] sm:$0xff] (%p5393_p5), %v3801_v10  ;;  %v3827_v23 = vld [vmem:[%s6184_s13 + $0x158] sm:$0xff] (%p5393_p5) }
 0x200   : > { %4299 = vst.msk [vmem:[%s6184_s13 + $0x178] sm:$0xff] %vm269_vm1, %v3523_v36  ;;  %4314 = vst.msk [vmem:[%s6184_s13 + $0x1f0] sm:$0xff] %vm269_vm1, %v3555_v42  ;;  %v3825_v22 = vld [vmem:[%s6184_s13 + $0x150] sm:$0xff] (%p5393_p5)  ;;  %v3855_v33 = vld [vmem:[%s6184_s13 + $0x1c8] sm:$0xff] (%p5393_p5) }
 0x201   : > { %4298 = vst.msk [vmem:[%s6184_s13 + $0x170] sm:$0xff] %vm269_vm1, %v3522_v41  ;;  %3742 = vst [vmem:[%s6392_s28] sm:$0xff] (%p5393_p5), %v3741_v40  ;;  %v3857_v36 = vld [vmem:[%s6184_s13 + $0x1d0] sm:$0xff] (%p5393_p5)  ;;  %v3859_v37 = vld [vmem:[%s6184_s13 + $0x1d8] sm:$0xff] (%p5393_p5) }
 0x202   : > { %3804 = vst [vmem:[%s6392_s28 + $0x178] sm:$0xff] %v3803_v11  ;;  %3806 = vst [vmem:[%s6392_s28 + $0x200] sm:$0xff] %v3805_v12  ;;  %v3863_v39 = vld [vmem:[%s6184_s13 + $0x1e8] sm:$0xff] }
 0x203   : > { %3808 = vst [vmem:[%s6392_s28 + $0x208] sm:$0xff] %v3807_v13  ;;  %3810 = vst [vmem:[%s6392_s28 + $0x210] sm:$0xff] %v3809_v14  ;;  %v3831_v25 = vld [vmem:[%s6184_s13 + $0x168] sm:$0xff]  ;;  %v3861_v38 = vld [vmem:[%s6184_s13 + $0x1e0] sm:$0xff] }
 0x204   : > { %3812 = vst [vmem:[%s6392_s28 + $0x218] sm:$0xff] %v3811_v15  ;;  %3814 = vst [vmem:[%s6392_s28 + $0x220] sm:$0xff] %v3813_v16  ;;  %v3829_v24 = vld [vmem:[%s6184_s13 + $0x160] sm:$0xff] }
 0x205   : > { %3816 = vst [vmem:[%s6392_s28 + $0x228] sm:$0xff] %v3815_v17  ;;  %3818 = vst [vmem:[%s6392_s28 + $0x230] sm:$0xff] %v3817_v18 }
 0x206   : > { %3820 = vst [vmem:[%s6392_s28 + $0x238] sm:$0xff] %v3819_v19  ;;  %3822 = vst [vmem:[%s6392_s28 + $0x240] sm:$0xff] %v3821_v20  ;;  %v3867_v42 = vld [vmem:[%s6184_s13 + $0x1f8] sm:$0xff] }
 0x207   : > { %3824 = vst [vmem:[%s6392_s28 + $0x248] sm:$0xff] %v3823_v21  ;;  %3826 = vst [vmem:[%s6392_s28 + $0x250] sm:$0xff] %v3825_v22  ;;  %v3835_v27 = vld [vmem:[%s6184_s13 + $0x178] sm:$0xff]  ;;  %v3865_v41 = vld [vmem:[%s6184_s13 + $0x1f0] sm:$0xff] }
 0x208   : > { %3828 = vst [vmem:[%s6392_s28 + $0x258] sm:$0xff] %v3827_v23  ;;  %3830 = vst [vmem:[%s6392_s28 + $0x260] sm:$0xff] %v3829_v24  ;;  %v3833_v26 = vld [vmem:[%s6184_s13 + $0x170] sm:$0xff] }
 0x209   : > { %3832 = vst [vmem:[%s6392_s28 + $0x268] sm:$0xff] %v3831_v25  ;;  %3834 = vst [vmem:[%s6392_s28 + $0x270] sm:$0xff] %v3833_v26 }
 0x20a   : > { %3836 = vst [vmem:[%s6392_s28 + $0x278] sm:$0xff] %v3835_v27  ;;  %3838 = vst [vmem:[%s6392_s28 + $0x300] sm:$0xff] %v3837_v28 }
 0x20b   : > { %3840 = vst [vmem:[%s6392_s28 + $0x308] sm:$0xff] %v3839_v29  ;;  %3842 = vst [vmem:[%s6392_s28 + $0x310] sm:$0xff] %v3841_v30 }
 0x20c   : > { %3844 = vst [vmem:[%s6392_s28 + $0x318] sm:$0xff] %v3843_v31  ;;  %3846 = vst [vmem:[%s6392_s28 + $0x320] sm:$0xff] %v3845_v34 }
 0x20d   : > { %3848 = vst [vmem:[%s6392_s28 + $0x328] sm:$0xff] %v3847_v35  ;;  %3850 = vst [vmem:[%s6392_s28 + $0x330] sm:$0xff] %v3849_v48 }
 0x20e   : > { %3852 = vst [vmem:[%s6392_s28 + $0x338] sm:$0xff] %v3851_v49  ;;  %3854 = vst [vmem:[%s6392_s28 + $0x340] sm:$0xff] %v3853_v32 }
 0x20f   : > { %3856 = vst [vmem:[%s6392_s28 + $0x348] sm:$0xff] %v3855_v33  ;;  %3858 = vst [vmem:[%s6392_s28 + $0x350] sm:$0xff] %v3857_v36 }
 0x210   : > { %3860 = vst [vmem:[%s6392_s28 + $0x358] sm:$0xff] %v3859_v37  ;;  %3862 = vst [vmem:[%s6392_s28 + $0x360] sm:$0xff] %v3861_v38 }
 0x211   : > { %3864 = vst [vmem:[%s6392_s28 + $0x368] sm:$0xff] %v3863_v39  ;;  %3866 = vst [vmem:[%s6392_s28 + $0x370] sm:$0xff] %v3865_v41 }
 0x212   : > { %3868 = vst [vmem:[%s6392_s28 + $0x378] sm:$0xff] %v3867_v42 }
 0x213 PF: > { %s14_s21 = sadd.s32 1, %s5320_s21   ;;  %s6540_s15 = smov %s5300_s16 }
 0x214   : > { %p11_p12 = scmp.ge.s32.totalorder %s14_s21, 6   ;;  %s6541_s16 = smov %s5404_s30 }
 0x215   : > { %s6542_s17 = smov %s5312_s19  ;;  %s6543_s18 = smov %s5316_s20 }
 0x216   : > { %s6544_s19 = smov %s6547_s22  ;;  %s6545_s20 = smov %s6551_s23 }
 0x217   :  { %13 = sbr.rel (!%p11_p12) target bundleno = 4 (0x4), region = 129 }

</bundles_post_ra>
